<compile_context>
chip_gen: v5e
topology: v5e:2x2
jax: 0.10.0
libtpu: 0.0.40
codegen_flags: <defaults>
</compile_context>

<pallas_src>
import jax
import jax.numpy as jnp
from jax.experimental import pallas as pl
from jax.experimental.pallas import tpu as pltpu

NUM_EDGE_LAYER = 2   # args.num_edge_layer
NUM_NODE_LAYER = 2   # args.num_node_layer


# ---------------------------------------------------------------------------
# Pallas kernel: entire forward hot path.
# ---------------------------------------------------------------------------
def rshn_kernel(x_ref, fc1_ref, relx_ref, a_rel_ref, emb_ref, g_node_ref,
                s_node_ref, inv_deg_ref, nn_w_ref, nn_b_ref,
                fc2_w_ref, fc2_b_ref, out_ref):
    # --- hoist all full-block loads once (loops below are Python-unrolled) ---
    x_in    = x_ref[...]        # bf16 [N, F_IN]
    fc1     = fc1_ref[...]      # bf16 [F_IN, DIM]
    rel_x   = relx_ref[...]     # f32  [R, RFEAT]
    a_rel   = a_rel_ref[...]    # f32  [R, R]   (pre-folded RelationConv operator)
    emb     = emb_ref[...]      # bf16 [E, R]   (0/1 one-hot of edge_type)
    g_node  = g_node_ref[...]   # bf16 [E, N]   (0/1 gather x[src])
    s_node  = s_node_ref[...]   # bf16 [N, E]   (0/1 scatter-sum by dst)
    inv_deg = inv_deg_ref[...]  # f32  [N, 1]   (1/deg, mean normalization)
    nn_w    = nn_w_ref[...]     # f32  [RFEAT, DIM]
    nn_b    = nn_b_ref[...]     # f32  [1, DIM]
    fc2_w   = fc2_w_ref[...]    # f32  [DIM, C]
    fc2_b   = fc2_b_ref[...]    # f32  [1, C]

    # x = torch.spmm(data.x, fc1); dropout(training=False) == identity
    x = jnp.dot(x_in, fc1, preferred_element_type=jnp.float32)        # f32 [N, DIM]

    # Relation (coarsened line-graph) convolutions, pre-folded:
    #   out = relu(rel_x + A_rel @ rel_x)
    for _ in range(NUM_EDGE_LAYER):
        rel_x = jnp.maximum(
            rel_x + jnp.dot(a_rel, rel_x, preferred_element_type=jnp.float32),
            0.0)

    # Loop-invariant edge weights (shared `nn`, shared edge_attr):
    #   w = nn(F.embedding(edge_type, rel_x)) = emb @ (rel_x @ nn_w) + nn_b
    rel_nn = jnp.dot(rel_x, nn_w, preferred_element_type=jnp.float32)  # f32 [R, DIM]
    w = jnp.dot(emb, rel_nn.astype(jnp.bfloat16),
                preferred_element_type=jnp.float32) + nn_b             # f32 [E, DIM]

    # Node convolutions: out_i = tanh( mean_{j->i}( x_j * w_ij ) )
    for _ in range(NUM_NODE_LAYER):
        xj = jnp.dot(g_node, x.astype(jnp.bfloat16),
                     preferred_element_type=jnp.float32)               # f32 [E, DIM]
        msg = (xj * w).astype(jnp.bfloat16)
        agg = jnp.dot(s_node, msg, preferred_element_type=jnp.float32) # f32 [N, DIM] (sum)
        x = jnp.tanh(agg * inv_deg)                                    # mean + tanh

    # fc2 + numerically-stable log_softmax(dim=1)
    logits = jnp.dot(x, fc2_w, preferred_element_type=jnp.float32) + fc2_b
    m = jnp.max(logits, axis=-1, keepdims=True)
    z = logits - m
    lse = jnp.log(jnp.sum(jnp.exp(z), axis=-1, keepdims=True))
    out_ref[...] = z - lse


# ---------------------------------------------------------------------------
# Wrapper: casts MXU operands to bf16 and launches one grid-less pallas_call.
# ---------------------------------------------------------------------------
def rshn_forward(x, fc1, rel_x0, a_rel, emb, g_node, s_node, inv_deg,
                 nn_w, nn_b, fc2_w, fc2_b):
    n_nodes = x.shape[0]
    n_classes = fc2_w.shape[1]
    bf16 = jnp.bfloat16
    inputs = (
        x.astype(bf16), fc1.astype(bf16),           # dense feature matmul operands
        rel_x0.astype(jnp.float32),                 # tiny relation path stays f32
        a_rel.astype(jnp.float32),
        emb.astype(bf16),                           # exact 0/1 operators -> bf16
        g_node.astype(bf16), s_node.astype(bf16),
        inv_deg.astype(jnp.float32),                # 1/deg kept in f32 post-scatter
        nn_w.astype(jnp.float32), nn_b.astype(jnp.float32),
        fc2_w.astype(jnp.float32), fc2_b.astype(jnp.float32),
    )
    vmem = pl.BlockSpec(memory_space=pltpu.MemorySpace.VMEM)
    return pl.pallas_call(
        rshn_kernel,
        out_shape=jax.ShapeDtypeStruct((n_nodes, n_classes), jnp.float32),
        in_specs=[vmem] * len(inputs),
        out_specs=vmem,
    )(*inputs)


# ---------------------------------------------------------------------------
# Plain-JAX glue: dense gather / scatter operators from edge lists.
# ---------------------------------------------------------------------------
def build_dense_ops(src, dst, n):
    g = jax.nn.one_hot(src, n, dtype=jnp.float32)          # [E, n] gather x[src]
    s = jax.nn.one_hot(dst, n, dtype=jnp.float32).T        # [n, E] scatter-sum by dst
    deg = jnp.maximum(jnp.sum(s, axis=1, keepdims=True), 1.0)
    inv_deg = 1.0 / deg                                     # [n, 1] (isolated nodes -> 1)
    return g, s, inv_deg


# ---------------------------------------------------------------------------
# Pure-JAX f32 reference (unfused form) for a loose numerical check.
# ---------------------------------------------------------------------------
def ref_forward(x, fc1, rel_x0, rel_ea, g_rel, s_rel, inv_deg_rel,
                g_node, s_node, inv_deg, emb, nn_w, nn_b, fc2_w, fc2_b):
    x = x @ fc1
    rel_x = rel_x0
    for _ in range(NUM_EDGE_LAYER):
        xj = g_rel @ rel_x
        agg = (s_rel @ (xj * rel_ea)) * inv_deg_rel
        rel_x = jnp.maximum(rel_x + agg, 0.0)
    edge_attr = emb @ rel_x
    w = edge_attr @ nn_w + nn_b
    for _ in range(NUM_NODE_LAYER):
        xj = g_node @ x
        x = jnp.tanh((s_node @ (xj * w)) * inv_deg)
    logits = x @ fc2_w + fc2_b
    return jax.nn.log_softmax(logits, axis=1)


if __name__ == "__main__":
    # synthetic sizes (DIM lane-dense = 128; classes small per module semantics)
    N, F_IN, DIM, C = 128, 64, 128, 16   # nodes, node feats, hidden dim, classes
    R, RFEAT = 16, 16                    # relation-graph nodes, relation feats
    E, RE = 512, 48                      # node-graph edges, relation-graph edges

    key = jax.random.PRNGKey(0)
    ks = jax.random.split(key, 12)

    # data
    x = jax.random.normal(ks[0], (N, F_IN), jnp.float32)          # data.x (treated dense)
    rel_x0 = jax.random.normal(ks[1], (R, RFEAT), jnp.float32)    # rel_data.x
    src = jax.random.randint(ks[2], (E,), 0, N)                   # data.edge_index[0]
    dst = jax.random.randint(ks[3], (E,), 0, N)                   # data.edge_index[1]
    edge_type = jax.random.randint(ks[4], (E,), 0, R)             # data.edge_type
    rel_src = jax.random.randint(ks[5], (RE,), 0, R)              # rel_data.edge_index[0]
    rel_dst = jax.random.randint(ks[6], (RE,), 0, R)              # rel_data.edge_index[1]
    rel_ea = jax.random.uniform(ks[7], (RE, 1), jnp.float32)      # rel_data.edge_attr

    # parameters (deterministic synthetic init)
    fc1 = 0.1 * jax.random.normal(ks[8], (F_IN, DIM), jnp.float32)    # self.fc1
    nn_w = 0.1 * jax.random.normal(ks[9], (RFEAT, DIM), jnp.float32)  # nn = Linear(rel_feat, dim)
    nn_b = 0.01 * jnp.ones((1, DIM), jnp.float32)
    fc2_w = 0.1 * jax.random.normal(ks[10], (DIM, C), jnp.float32)    # fc2 = Linear(dim, classes)
    fc2_b = 0.01 * jnp.ones((1, C), jnp.float32)

    # dense graph operators (0/1, degree normalization kept separate in f32)
    g_node, s_node, inv_deg = build_dense_ops(src, dst, N)            # [E,N],[N,E],[N,1]
    g_rel, s_rel, inv_deg_rel = build_dense_ops(rel_src, rel_dst, R)  # [RE,R],[R,RE],[R,1]
    emb = jax.nn.one_hot(edge_type, R, dtype=jnp.float32)             # [E,R] embedding lookup

    # pre-fold the whole RelationConv aggregation into one [R,R] operator
    a_rel = jnp.dot(inv_deg_rel * s_rel, rel_ea * g_rel)              # [R, R]

    out = rshn_forward(x, fc1, rel_x0, a_rel, emb, g_node, s_node, inv_deg,
                       nn_w, nn_b, fc2_w, fc2_b)
    out = jax.block_until_ready(out)

    ref = ref_forward(x, fc1, rel_x0, rel_ea, g_rel, s_rel, inv_deg_rel,
                      g_node, s_node, inv_deg, emb, nn_w, nn_b, fc2_w, fc2_b)

    assert out.shape == (N, C)
    assert bool(jnp.all(jnp.isfinite(out)))
    # rows of log_softmax must sum (in prob space) to ~1
    assert bool(jnp.allclose(jnp.sum(jnp.exp(out), axis=1), 1.0, atol=1e-4))
    # matches f32 reference within bf16-operand tolerance
    assert bool(jnp.max(jnp.abs(out - ref)) < 0.15)
    print("KERNEL_OK")
</pallas_src>

<mosaic_0001>
module attributes {stable_mosaic.version = 11 : i64} {
  func.func @rshn_kernel(%arg0: memref<128x64xbf16, #tpu.memory_space<vmem>>, %arg1: memref<64x128xbf16, #tpu.memory_space<vmem>>, %arg2: memref<16x16xf32, #tpu.memory_space<vmem>>, %arg3: memref<16x16xf32, #tpu.memory_space<vmem>>, %arg4: memref<512x16xbf16, #tpu.memory_space<vmem>>, %arg5: memref<512x128xbf16, #tpu.memory_space<vmem>>, %arg6: memref<128x512xbf16, #tpu.memory_space<vmem>>, %arg7: memref<128x1xf32, #tpu.memory_space<vmem>>, %arg8: memref<16x128xf32, #tpu.memory_space<vmem>>, %arg9: memref<1x128xf32, #tpu.memory_space<vmem>>, %arg10: memref<128x16xf32, #tpu.memory_space<vmem>>, %arg11: memref<1x16xf32, #tpu.memory_space<vmem>>, %arg12: memref<128x16xf32, #tpu.memory_space<vmem>>) attributes {dimension_semantics = [], scalar_prefetch = 0 : i64, scratch_operands = 0 : i64, tpu.core_type = #tpu.core_type<tc>} {
    %c0 = arith.constant 0 : index
    %c0_0 = arith.constant 0 : index
    %0 = vector.load %arg0[%c0, %c0_0] : memref<128x64xbf16, #tpu.memory_space<vmem>>, vector<128x64xbf16>
    %c0_1 = arith.constant 0 : index
    %c0_2 = arith.constant 0 : index
    %1 = vector.load %arg1[%c0_1, %c0_2] : memref<64x128xbf16, #tpu.memory_space<vmem>>, vector<64x128xbf16>
    %c0_3 = arith.constant 0 : index
    %c0_4 = arith.constant 0 : index
    %2 = vector.load %arg2[%c0_3, %c0_4] : memref<16x16xf32, #tpu.memory_space<vmem>>, vector<16x16xf32>
    %c0_5 = arith.constant 0 : index
    %c0_6 = arith.constant 0 : index
    %3 = vector.load %arg3[%c0_5, %c0_6] : memref<16x16xf32, #tpu.memory_space<vmem>>, vector<16x16xf32>
    %c0_7 = arith.constant 0 : index
    %c0_8 = arith.constant 0 : index
    %4 = vector.load %arg4[%c0_7, %c0_8] : memref<512x16xbf16, #tpu.memory_space<vmem>>, vector<512x16xbf16>
    %c0_9 = arith.constant 0 : index
    %c0_10 = arith.constant 0 : index
    %5 = vector.load %arg5[%c0_9, %c0_10] : memref<512x128xbf16, #tpu.memory_space<vmem>>, vector<512x128xbf16>
    %c0_11 = arith.constant 0 : index
    %c0_12 = arith.constant 0 : index
    %6 = vector.load %arg6[%c0_11, %c0_12] : memref<128x512xbf16, #tpu.memory_space<vmem>>, vector<128x512xbf16>
    %c0_13 = arith.constant 0 : index
    %c0_14 = arith.constant 0 : index
    %7 = vector.load %arg7[%c0_13, %c0_14] : memref<128x1xf32, #tpu.memory_space<vmem>>, vector<128x1xf32>
    %c0_15 = arith.constant 0 : index
    %c0_16 = arith.constant 0 : index
    %8 = vector.load %arg8[%c0_15, %c0_16] : memref<16x128xf32, #tpu.memory_space<vmem>>, vector<16x128xf32>
    %c0_17 = arith.constant 0 : index
    %c0_18 = arith.constant 0 : index
    %9 = vector.load %arg9[%c0_17, %c0_18] : memref<1x128xf32, #tpu.memory_space<vmem>>, vector<1x128xf32>
    %c0_19 = arith.constant 0 : index
    %c0_20 = arith.constant 0 : index
    %10 = vector.load %arg10[%c0_19, %c0_20] : memref<128x16xf32, #tpu.memory_space<vmem>>, vector<128x16xf32>
    %c0_21 = arith.constant 0 : index
    %c0_22 = arith.constant 0 : index
    %11 = vector.load %arg11[%c0_21, %c0_22] : memref<1x16xf32, #tpu.memory_space<vmem>>, vector<1x16xf32>
    %cst = arith.constant dense<0.000000e+00> : vector<128x128xf32>
    %12 = tpu.matmul %0, %1, %cst {dimension_numbers = #tpu.dot_dimension_numbers<[1], [0], [0], [1], [0, 0, 1, 1], [], []>} : vector<128x64xbf16>, vector<64x128xbf16>, vector<128x128xf32> -> vector<128x128xf32>
    %cst_23 = arith.constant dense<0.000000e+00> : vector<16x16xf32>
    %13 = tpu.matmul %3, %2, %cst_23 {dimension_numbers = #tpu.dot_dimension_numbers<[1], [0], [0], [1], [0, 0, 1, 1], [], []>} : vector<16x16xf32>, vector<16x16xf32>, vector<16x16xf32> -> vector<16x16xf32>
    %14 = arith.addf %2, %13 : vector<16x16xf32>
    %cst_24 = arith.constant 0.000000e+00 : f32
    %15 = vector.broadcast %cst_24 : f32 to vector<16x16xf32>
    %16 = arith.maximumf %14, %15 : vector<16x16xf32>
    %cst_25 = arith.constant dense<0.000000e+00> : vector<16x16xf32>
    %17 = tpu.matmul %3, %16, %cst_25 {dimension_numbers = #tpu.dot_dimension_numbers<[1], [0], [0], [1], [0, 0, 1, 1], [], []>} : vector<16x16xf32>, vector<16x16xf32>, vector<16x16xf32> -> vector<16x16xf32>
    %18 = arith.addf %16, %17 : vector<16x16xf32>
    %cst_26 = arith.constant 0.000000e+00 : f32
    %19 = vector.broadcast %cst_26 : f32 to vector<16x16xf32>
    %20 = arith.maximumf %18, %19 : vector<16x16xf32>
    %cst_27 = arith.constant dense<0.000000e+00> : vector<16x128xf32>
    %21 = tpu.matmul %20, %8, %cst_27 {dimension_numbers = #tpu.dot_dimension_numbers<[1], [0], [0], [1], [0, 0, 1, 1], [], []>} : vector<16x16xf32>, vector<16x128xf32>, vector<16x128xf32> -> vector<16x128xf32>
    %22 = arith.truncf %21 : vector<16x128xf32> to vector<16x128xbf16>
    %cst_28 = arith.constant dense<0.000000e+00> : vector<512x128xf32>
    %23 = tpu.matmul %4, %22, %cst_28 {dimension_numbers = #tpu.dot_dimension_numbers<[1], [0], [0], [1], [0, 0, 1, 1], [], []>} : vector<512x16xbf16>, vector<16x128xbf16>, vector<512x128xf32> -> vector<512x128xf32>
    %24 = vector.broadcast %9 : vector<1x128xf32> to vector<512x128xf32>
    %25 = arith.addf %23, %24 : vector<512x128xf32>
    %26 = arith.truncf %12 : vector<128x128xf32> to vector<128x128xbf16>
    %cst_29 = arith.constant dense<0.000000e+00> : vector<512x128xf32>
    %27 = tpu.matmul %5, %26, %cst_29 {dimension_numbers = #tpu.dot_dimension_numbers<[1], [0], [0], [1], [0, 0, 1, 1], [], []>} : vector<512x128xbf16>, vector<128x128xbf16>, vector<512x128xf32> -> vector<512x128xf32>
    %28 = arith.mulf %27, %25 : vector<512x128xf32>
    %29 = arith.truncf %28 : vector<512x128xf32> to vector<512x128xbf16>
    %cst_30 = arith.constant dense<0.000000e+00> : vector<128x128xf32>
    %30 = tpu.matmul %6, %29, %cst_30 {dimension_numbers = #tpu.dot_dimension_numbers<[1], [0], [0], [1], [0, 0, 1, 1], [], []>} : vector<128x512xbf16>, vector<512x128xbf16>, vector<128x128xf32> -> vector<128x128xf32>
    %31 = vector.broadcast %7 : vector<128x1xf32> to vector<128x128xf32>
    %32 = arith.mulf %30, %31 : vector<128x128xf32>
    %33 = math.tanh %32 : vector<128x128xf32>
    %34 = arith.truncf %33 : vector<128x128xf32> to vector<128x128xbf16>
    %cst_31 = arith.constant dense<0.000000e+00> : vector<512x128xf32>
    %35 = tpu.matmul %5, %34, %cst_31 {dimension_numbers = #tpu.dot_dimension_numbers<[1], [0], [0], [1], [0, 0, 1, 1], [], []>} : vector<512x128xbf16>, vector<128x128xbf16>, vector<512x128xf32> -> vector<512x128xf32>
    %36 = arith.mulf %35, %25 : vector<512x128xf32>
    %37 = arith.truncf %36 : vector<512x128xf32> to vector<512x128xbf16>
    %cst_32 = arith.constant dense<0.000000e+00> : vector<128x128xf32>
    %38 = tpu.matmul %6, %37, %cst_32 {dimension_numbers = #tpu.dot_dimension_numbers<[1], [0], [0], [1], [0, 0, 1, 1], [], []>} : vector<128x512xbf16>, vector<512x128xbf16>, vector<128x128xf32> -> vector<128x128xf32>
    %39 = vector.broadcast %7 : vector<128x1xf32> to vector<128x128xf32>
    %40 = arith.mulf %38, %39 : vector<128x128xf32>
    %41 = math.tanh %40 : vector<128x128xf32>
    %cst_33 = arith.constant dense<0.000000e+00> : vector<128x16xf32>
    %42 = tpu.matmul %41, %10, %cst_33 {dimension_numbers = #tpu.dot_dimension_numbers<[1], [0], [0], [1], [0, 0, 1, 1], [], []>} : vector<128x128xf32>, vector<128x16xf32>, vector<128x16xf32> -> vector<128x16xf32>
    %43 = vector.broadcast %11 : vector<1x16xf32> to vector<128x16xf32>
    %44 = arith.addf %42, %43 : vector<128x16xf32>
    %cst_34 = arith.constant dense<0xFF800000> : vector<128xf32>
    %45 = vector.multi_reduction <maximumf>, %44, %cst_34 [1] : vector<128x16xf32> to vector<128xf32>
    %46 = vector.shape_cast %45 : vector<128xf32> to vector<128x1xf32>
    %47 = vector.broadcast %46 : vector<128x1xf32> to vector<128x16xf32>
    %48 = arith.subf %44, %47 : vector<128x16xf32>
    %49 = math.exp %48 : vector<128x16xf32>
    %cst_35 = arith.constant dense<0.000000e+00> : vector<128xf32>
    %50 = vector.multi_reduction <add>, %49, %cst_35 [1] : vector<128x16xf32> to vector<128xf32>
    %51 = vector.shape_cast %50 : vector<128xf32> to vector<128x1xf32>
    %52 = math.log %51 : vector<128x1xf32>
    %53 = vector.broadcast %52 : vector<128x1xf32> to vector<128x16xf32>
    %54 = arith.subf %48, %53 : vector<128x16xf32>
    %c0_36 = arith.constant 0 : index
    %c0_37 = arith.constant 0 : index
    %55 = vector.load %arg12[%c0_36, %c0_37] : memref<128x16xf32, #tpu.memory_space<vmem>>, vector<128x16xf32>
    tpu.vector_store %arg12[%c0_36, %c0_37], %54 {strides = array<i32>} : memref<128x16xf32, #tpu.memory_space<vmem>>, vector<128x16xf32>,
    return
  }
}

</mosaic_0001>

<bundles_post_ra>
// kernel: tpu_custom_call.1
= control target key start
LH: loop header
LB: loop body
LE: loop exit
PB: predicated region body
PF: predicated region fallthrough
CT: control target
= control target key end

     0   :  { %17 = vsyncpa [#allocation3], 0  ;;  %s3448_s24 = smov [#allocation2]   ;;  %s3449_s26 = smov 256   ;;  %s5145_s0 = inlined_call_operand.vmem [shape: bf16[128,64], index: 0, kind: input, shape index: {}]   ;;  %s5146_s1 = inlined_call_operand.vmem [shape: bf16[64,128], index: 1, kind: input, shape index: {}]   ;;  %s5147_s2 = inlined_call_operand.vmem [shape: f32[16,16], index: 2, kind: input, shape index: {}]   ;;  %s5148_s3 = inlined_call_operand.vmem [shape: f32[16,16], index: 3, kind: input, shape index: {}]   ;;  %s5149_s4 = inlined_call_operand.vmem [shape: bf16[512,16], index: 4, kind: input, shape index: {}]   ;;  %s5150_s5 = inlined_call_operand.vmem [shape: bf16[512,128], index: 5, kind: input, shape index: {}]   ;;  %s5151_s6 = inlined_call_operand.hbm [shape: bf16[128,512], index: 6, kind: input, shape index: {}]   ;;  %s5152_s7 = inlined_call_operand.vmem [shape: f32[128,1], index: 7, kind: input, shape index: {}]   ;;  %s5153_s8 = inlined_call_operand.vmem [shape: f32[16,128], index: 8, kind: input, shape index: {}]   ;;  %s5154_s9 = inlined_call_operand.vmem [shape: f32[1,128], index: 9, kind: input, shape index: {}]   ;;  %s5155_s10 = inlined_call_operand.vmem [shape: f32[128,16], index: 10, kind: input, shape index: {}]   ;;  %s5156_s11 = inlined_call_operand.vmem [shape: f32[1,16], index: 11, kind: input, shape index: {}]   ;;  %s5157_s12 = inlined_call_operand.vmem [shape: f32[128,16], index: 12, kind: output, shape index: {}]  }
   0x1   :  { %s34_s23 = sshll.u32 %s5151_s6, 4  ;;  %s36_s25 = sshll.u32 %s3448_s24, 4  ;;  %s35_s23 = int_to_ptr.hbm [resolvable:$true] %s34_s23  ;;  %s37_s25 = int_to_ptr.vmem [resolvable:$true] %s36_s25 }
   0x2   :  { %s3450_s27 = smov 16  }
   0x3   :  { %42 = dma.hbm_to_vmem [thread:$0]  %s35_s23, 4096, %s37_s25, [#allocation3], %s3449_s26, %s3449_s26, %s3450_s27  }
   0x4   :  { %3446 = dma.done.wait [#allocation3], 4096  }
   0x5   :  { %3447 = vsyncadd [#allocation3], 4294963200  ;;  %v83_v0 = vld [vmem:[%s5147_s2 + $0x8] sm:$0xff]  ;;  %v82_v1 = vld [vmem:[%s5147_s2] sm:$0xff]  ;;  %vm420_vm0 = vcmask 130048   ;;  %vm346_vm1 = vcmask 523264  }
   0x6   :  { %441 = vmatpush.msra.mxu1 %v83_v0  ;;  %v84_v2 = vld [vmem:[%s5148_s3] sm:$0xff]  ;;  %v3143_v3 = vld [vmem:[%s5146_s1 + $0x18] sm:$0xff]  ;;  %v3142_v4 = vld [vmem:[%s5146_s1 + $0x10] sm:$0xff] }
   0x7   :  { %3240 = vmatpush.bf16.msra.mxu2 %v3143_v3  ;;  %375 = vmatpush.bf16.msra.mxu0 %v3143_v3  ;;  %v3141_v5 = vld [vmem:[%s5146_s1 + $0x8] sm:$0xff]  ;;  %v3140_v7 = vld [vmem:[%s5146_s1] sm:$0xff]  ;;  %v3138_v10 = vld [vmem:[%s5145_s0 + $0x30] sm:$0xff] }
   0x8   :  { %442 = vmatpush.msra.mxu1 %v82_v1  ;;  %v85_v6 = vld [vmem:[%s5148_s3 + $0x8] sm:$0xff]  ;;  %v3132_v9 = vld [vmem:[%s5145_s0] sm:$0xff]  ;;  %v3139_v11 = vld [vmem:[%s5145_s0 + $0x38] sm:$0xff] }
   0x9   :  { %2710 = vmatmul.msk.f32.vlgmr.msra.gmra.mxu1 %vm420_vm0, %v84_v2  ;;  %v3137_v8 = vld [vmem:[%s5145_s0 + $0x28] sm:$0xff]  ;;  %v3134_v13 = vld [vmem:[%s5145_s0 + $0x10] sm:$0xff]  ;;  %v3135_v14 = vld [vmem:[%s5145_s0 + $0x18] sm:$0xff] }
   0xa   :  { %v3133_v12 = vld [vmem:[%s5145_s0 + $0x8] sm:$0xff]  ;;  %v3136_v21 = vld [vmem:[%s5145_s0 + $0x20] sm:$0xff]  ;;  %v3178_v56 = vld [vmem:[%s5150_s5 + $0x10] sm:$0xff] }
   0xb   :  { %3241 = vmatpush.bf16.msra.mxu2 %v3142_v4  ;;  %376 = vmatpush.bf16.msra.mxu0 %v3142_v4  ;;  %v263_v36 = vld [vmem:[%s5153_s8 + $0x8] sm:$0xff]  ;;  %v262_v37 = vld [vmem:[%s5153_s8] sm:$0xff]  ;;  %v3179_v61 = vld [vmem:[%s5150_s5 + $0x18] sm:$0xff] }
   0xc   :  { %501 = vmatpush.msra.mxu3 %v263_v36  ;;  %v3176_v54 = vld [vmem:[%s5150_s5] sm:$0xff]  ;;  %v3177_v55 = vld [vmem:[%s5150_s5 + $0x8] sm:$0xff]  ;;  %v3182_v3 = vld [vmem:[%s5150_s5 + $0x30] sm:$0xff] }
   0xd   :  { %v3144_v60 = vld [vmem:[%s5149_s4] sm:$0xff]  ;;  %v3145_v62 = vld [vmem:[%s5149_s4 + $0x8] sm:$0xff] }
   0xe   :  { %502 = vmatpush.msra.mxu3 %v262_v37  ;;  %v3180_v63 = vld [vmem:[%s5150_s5 + $0x20] sm:$0xff] }
   0xf   :  { %3242 = vmatpush.bf16.msra.mxu2 %v3141_v5  ;;  %377 = vmatpush.bf16.msra.mxu0 %v3141_v5  ;;  %v3148_v4 = vld [vmem:[%s5149_s4 + $0x20] sm:$0xff]  ;;  %v3183_v5 = vld [vmem:[%s5150_s5 + $0x38] sm:$0xff] }
  0x11   :  { %2711 = vmatmul.msk.f32.gmra.mxu1 %vm420_vm0, %v85_v6 }
  0x13   :  { %3243 = vmatpush.bf16.msra.mxu2 %v3140_v7  ;;  %378 = vmatpush.bf16.msra.mxu0 %v3140_v7  ;;  %v3184_v7 = vld [vmem:[%s5150_s5 + $0x40] sm:$0xff] }
  0x16   :  { %2707 = vmatmul.msk.bf16.vlgmr.msra.gmra.mxu2 %vm346_vm1, %v3137_v8  ;;  %2702 = vmatmul.msk.bf16.vlgmr.msra.gmra.mxu0 %vm346_vm1, %v3132_v9  ;;  %v3150_v9 = vld [vmem:[%s5149_s4 + $0x30] sm:$0xff] }
  0x26   :  { %2708 = vmatmul.msk.bf16.gmra.mxu2 %vm346_vm1, %v3138_v10  ;;  %2703 = vmatmul.msk.bf16.gmra.mxu0 %vm346_vm1, %v3133_v12 }
  0x36   :  { %2709 = vmatmul.msk.bf16.gmra.mxu2 %vm346_vm1, %v3139_v11  ;;  %2704 = vmatmul.msk.bf16.gmra.mxu0 %vm346_vm1, %v3134_v13  ;;  %v3185_v11 = vld [vmem:[%s5150_s5 + $0x48] sm:$0xff]  ;;  %v3151_v13 = vld [vmem:[%s5149_s4 + $0x38] sm:$0xff] }
  0x46   :  { %2705 = vmatmul.msk.bf16.gmra.mxu0 %vm346_vm1, %v3135_v14 }
  0x56   :  { %2706 = vmatmul.msk.bf16.gmra.mxu0 %vm346_vm1, %v3136_v21  ;;  %v3187_v21 = vld [vmem:[%s5150_s5 + $0x58] sm:$0xff] }
  0x86   :  { %v444_v15 = vpop.f32.mrf.mxu1 }
  0x87   :  { %v450_v17 = vadd.f32 %v444_v15, %v82_v1  ;;  %v3181_v1 = vld [vmem:[%s5150_s5 + $0x28] sm:$0xff]  ;;  %v3186_v15 = vld [vmem:[%s5150_s5 + $0x50] sm:$0xff] }
  0x89   :  { %v452_v20 = vmax.f32 %v450_v17, 0.0  ;;  %v3152_v17 = vld [vmem:[%s5149_s4 + $0x40] sm:$0xff] }
  0x8e   :  { %v447_v16 = vpop.f32.mrf.mxu1 }
  0x8f   :  { %v451_v18 = vadd.f32 %v447_v16, %v83_v0  ;;  %v3146_v0 = vld [vmem:[%s5149_s4 + $0x10] sm:$0xff] }
  0x91   :  { %v453_v19 = vmax.f32 %v451_v18, 0.0 }
  0x93   :  { %468 = vmatpush.msrb.mxu2 %v453_v19  ;;  %v380_v31 = vpop.f32.mrf.mxu0 }
  0x95   :  { %469 = vmatpush.msrb.mxu2 %v452_v20 }
  0x96   :  { %2712 = vmatmul.msk.f32.vlgmr.msrb.gmra.mxu2 %vm420_vm0, %v84_v2  ;;  %v3147_v2 = vld [vmem:[%s5149_s4 + $0x18] sm:$0xff] }
  0x99   :  { %v405_v22 = vpop.f32.mrf.mxu2 }
  0x9b   :  { %v382_v32 = vpop.f32.mrf.mxu0 }
  0x9c   :  { %v939_v53 = vpack.c.bf16 %v382_v32, %v380_v31  ;;  %v3188_v32 = vld [vmem:[%s5150_s5 + $0x60] sm:$0xff] }
  0x9e   :  { %2713 = vmatmul.msk.f32.gmra.mxu2 %vm420_vm0, %v85_v6  ;;  %v3149_v6 = vld [vmem:[%s5149_s4 + $0x28] sm:$0xff] }
  0xa1   :  { %v407_v23 = vpop.f32.mrf.mxu2 }
  0xa2   :  { %v944_v30 = vpack.c.bf16 %v407_v23, %v405_v22 }
  0xa3   :  { %v385_v33 = vpop.f32.mrf.mxu0 }
  0xa9   :  { %v410_v24 = vpop.f32.mrf.mxu2 }
  0xab   :  { %v387_v34 = vpop.f32.mrf.mxu0 }
  0xac   :  { %v940_v52 = vpack.c.bf16 %v387_v34, %v385_v33 }
  0xb1   :  { %v412_v25 = vpop.f32.mrf.mxu2 }
  0xb2   :  { %v945_v29 = vpack.c.bf16 %v412_v25, %v410_v24 }
  0xb3   :  { %v390_v35 = vpop.f32.mrf.mxu0 }
  0xb9   :  { %v415_v26 = vpop.f32.mrf.mxu2 }
  0xbb   :  { %v392_v38 = vpop.f32.mrf.mxu0 }
  0xbc   :  { %v941_v50 = vpack.c.bf16 %v392_v38, %v390_v35 }
  0xc1   :  { %v417_v27 = vpop.f32.mrf.mxu2 }
  0xc2   :  { %v946_v28 = vpack.c.bf16 %v417_v27, %v415_v26 }
  0xc3   :  { %v395_v39 = vpop.f32.mrf.mxu0 }
  0xc4   :  { %1139 = vmatpush.bf16.msra.mxu2 %v946_v28 }
  0xc8   :  { %1140 = vmatpush.bf16.msra.mxu2 %v945_v29  ;;  %v3153_v29 = vld [vmem:[%s5149_s4 + $0x48] sm:$0xff] }
  0xcb   :  { %v397_v40 = vpop.f32.mrf.mxu0 }
  0xcc   :  { %1141 = vmatpush.bf16.msra.mxu2 %v944_v30  ;;  %v942_v47 = vpack.c.bf16 %v397_v40, %v395_v39  ;;  %v3154_v40 = vld [vmem:[%s5149_s4 + $0x50] sm:$0xff] }
  0xd3   :  { %v400_v41 = vpop.f32.mrf.mxu0 }
  0xdb   :  { %v402_v45 = vpop.f32.mrf.mxu0 }
  0xdc   :  { %v943_v46 = vpack.c.bf16 %v402_v45, %v400_v41 }
  0xde   :  { %1142 = vmatpush.bf16.msra.mxu2 %v943_v46 }
  0xe2   :  { %1143 = vmatpush.bf16.msra.mxu2 %v942_v47 }
  0xe6   :  { %1144 = vmatpush.bf16.msra.mxu2 %v941_v50 }
  0xea   :  { %1145 = vmatpush.bf16.msra.mxu2 %v940_v52 }
  0xee   :  { %1146 = vmatpush.bf16.msra.mxu2 %v939_v53 }
  0xf1   :  { %1147 = vmatmul.bf16.vlgmr.msra.gmra.mxu2 %v3176_v54  ;;  %v3190_v54 = vld [vmem:[%s5150_s5 + $0x70] sm:$0xff] }
 0x101   :  { %1152 = vmatmul.bf16.gmra.mxu2 %v3177_v55 }
 0x111   :  { %1157 = vmatmul.bf16.gmra.mxu2 %v3178_v56 }
 0x119   :  { %v471_v42 = vpop.f32.mrf.mxu2 }
 0x11a   :  { %v477_v43 = vadd.f32 %v471_v42, %v452_v20  ;;  %v3659_v20 = vld [vmem:[%s5154_s9] ss:$0 sm:$0xff] }
 0x11c   :  { %v479_v44 = vmax.f32 %v477_v43, 0.0  ;;  %v3189_v43 = vld [vmem:[%s5150_s5 + $0x68] sm:$0xff] }
 0x11e   :  { %2714 = vmatmul.msk.f32.vlgmr.msra.gmra.mxu3 %vm420_vm0, %v479_v44 }
 0x121   :  { %v474_v48 = vpop.f32.mrf.mxu2  ;;  %1162 = vmatmul.bf16.gmra.mxu2 %v3179_v61 }
 0x122   :  { %v478_v49 = vadd.f32 %v474_v48, %v453_v19 }
 0x124   :  { %v480_v51 = vmax.f32 %v478_v49, 0.0 }
 0x126   :  { %2715 = vmatmul.msk.f32.gmra.mxu3 %vm420_vm0, %v480_v51  ;;  %v3155_v51 = vld [vmem:[%s5149_s4 + $0x58] sm:$0xff] }
 0x131   :  { %1167 = vmatmul.bf16.gmra.mxu2 %v3180_v63 }
 0x141   :  { %1172 = vmatmul.bf16.gmra.mxu2 %v3181_v1  ;;  %v3191_v1 = vld [vmem:[%s5150_s5 + $0x78] sm:$0xff] }
 0x151   :  { %1177 = vmatmul.bf16.gmra.mxu2 %v3182_v3 }
 0x161   :  { %1182 = vmatmul.bf16.gmra.mxu2 %v3183_v5 }
 0x171   :  { %1187 = vmatmul.bf16.gmra.mxu2 %v3184_v7  ;;  %v3192_v7 = vld [vmem:[%s5150_s5 + $0x80] sm:$0xff] }
 0x174   :  { %v1148_v8 = vpop.f32.mrf.mxu2 }
 0x17c   :  { %v1150_v10 = vpop.f32.mrf.mxu2 }
 0x181   :  { %1192 = vmatmul.bf16.gmra.mxu2 %v3185_v11 }
 0x184   :  { %v1153_v12 = vpop.f32.mrf.mxu2 }
 0x18c   :  { %v1155_v14 = vpop.f32.mrf.mxu2 }
 0x191   :  { %1197 = vmatmul.bf16.gmra.mxu2 %v3186_v15 }
 0x194   :  { %v1158_v16 = vpop.f32.mrf.mxu2 }
 0x19c   :  { %v1160_v19 = vpop.f32.mrf.mxu2 }
 0x1a1   :  { %v504_v57 = vpop.f32.mrf.mxu3  ;;  %1202 = vmatmul.bf16.gmra.mxu2 %v3187_v21 }
 0x1a4   :  { %v1163_v25 = vpop.f32.mrf.mxu2 }
 0x1a9   :  { %v507_v58 = vpop.f32.mrf.mxu3 }
 0x1aa   :  { %v510_v59 = vpack.c.bf16 %v507_v58, %v504_v57 }
 0x1ac   :  { %777 = vmatpush.bf16.msrb.mxu1 %v510_v59  ;;  %v1165_v31 = vpop.f32.mrf.mxu2 }
 0x1af   :  { %2844 = vmatmul.msk.bf16.vlgmr.msrb.gmra.mxu1 %vm420_vm0, %v3144_v60 }
 0x1b1   :  { %1207 = vmatmul.bf16.gmra.mxu2 %v3188_v32 }
 0x1b4   :  { %v3688_v36 = vpop.f32.mrf.mxu2 }
 0x1bc   :  { %v3697_v42 = vpop.f32.mrf.mxu2 }
 0x1bf   :  { %2845 = vmatmul.msk.bf16.gmra.mxu1 %vm420_vm0, %v3145_v62  ;;  %v3156_v62 = vld [vmem:[%s5149_s4 + $0x60] sm:$0xff] }
 0x1c1   :  { %1212 = vmatmul.bf16.gmra.mxu2 %v3189_v43 }
 0x1c4   :  { %v3709_v47 = vpop.f32.mrf.mxu2 }
 0x1cc   :  { %v1175_v53 = vpop.f32.mrf.mxu2 }
 0x1cf   :  { %2846 = vmatmul.msk.bf16.gmra.mxu1 %vm420_vm0, %v3146_v0 }
 0x1d1   :  { %1217 = vmatmul.bf16.gmra.mxu2 %v3190_v54 }
 0x1d4   :  { %v1178_v58 = vpop.f32.mrf.mxu2 }
 0x1dc   :  { %v1180_v0 = vpop.f32.mrf.mxu2 }
 0x1df   :  { %2847 = vmatmul.msk.bf16.gmra.mxu1 %vm420_vm0, %v3147_v2 }
 0x1e1   :  { %1222 = vmatmul.bf16.gmra.mxu2 %v3191_v1 }
 0x1e4   :  { %v1183_v3 = vpop.f32.mrf.mxu2 }
 0x1ef   :  { %2848 = vmatmul.msk.bf16.gmra.mxu1 %vm420_vm0, %v3148_v4  ;;  %v3157_v4 = vld [vmem:[%s5149_s4 + $0x68] sm:$0xff] }
 0x1f1   :  { %1227 = vmatmul.bf16.gmra.mxu2 %v3192_v7 }
 0x1ff   :  { %2849 = vmatmul.msk.bf16.gmra.mxu1 %vm420_vm0, %v3149_v6  ;;  %v1185_v6 = vpop.f32.mrf.mxu2 }
 0x20f   :  { %2850 = vmatmul.msk.bf16.gmra.mxu1 %vm420_vm0, %v3150_v9  ;;  %v1188_v9 = vpop.f32.mrf.mxu2 }
 0x21f   :  { %2851 = vmatmul.msk.bf16.gmra.mxu1 %vm420_vm0, %v3151_v13  ;;  %v3193_v13 = vld [vmem:[%s5150_s5 + $0x88] sm:$0xff] }
 0x220   :  { %1232 = vmatmul.bf16.gmra.mxu2 %v3193_v13  ;;  %v3197_v13 = vld [vmem:[%s5150_s5 + $0xa8] sm:$0xff] }
 0x22c   :  { %v779_v18 = vpop.f32.mrf.mxu1 }
 0x22d   :  { %v3666_v22 = vadd.f32 %v3659_v20, %v779_v18 }
 0x22f   :  { %2852 = vmatmul.msk.bf16.gmra.mxu1 %vm420_vm0, %v3152_v17  ;;  %5254 = vst [vmem:[#allocation5_spill] sm:$0xff] %v3666_v22  ;;  %v1308_v26 = vmul.f32 %v1148_v8, %v3666_v22 }
 0x234   :  { %v781_v23 = vpop.f32.mrf.mxu1 }
 0x235   :  { %v3669_v24 = vadd.f32 %v3659_v20, %v781_v23 }
 0x237   :  { %5255 = vst [vmem:[#allocation6_spill] sm:$0xff] %v3669_v24  ;;  %v1309_v27 = vmul.f32 %v1150_v10, %v3669_v24  ;;  %v3158_v10 = vld [vmem:[%s5149_s4 + $0x70] sm:$0xff] }
 0x239   :  { %v3673_v28 = vpack.c.bf16 %v1309_v27, %v1308_v26 }
 0x23c   :  { %v784_v30 = vpop.f32.mrf.mxu1 }
 0x23d   :  { %v3683_v33 = vadd.f32 %v3659_v20, %v784_v30 }
 0x23f   :  { %2853 = vmatmul.msk.bf16.gmra.mxu1 %vm420_vm0, %v3153_v29  ;;  %5256 = vst [vmem:[#allocation7_spill] sm:$0xff] %v3683_v33  ;;  %v1310_v37 = vmul.f32 %v1153_v12, %v3683_v33  ;;  %v1190_v12 = vpop.f32.mrf.mxu2 }
 0x244   :  { %v786_v34 = vpop.f32.mrf.mxu1 }
 0x245   :  { %v3686_v35 = vadd.f32 %v3659_v20, %v786_v34 }
 0x247   :  { %5257 = vst [vmem:[#allocation8_spill] sm:$0xff] %v3686_v35  ;;  %v1311_v38 = vmul.f32 %v1155_v14, %v3686_v35  ;;  %v3753_v15 = vpop.f32.mrf.mxu2 }
 0x249   :  { %v3692_v39 = vpack.c.bf16 %v1311_v38, %v1310_v37 }
 0x24c   :  { %v789_v41 = vpop.f32.mrf.mxu1 }
 0x24d   :  { %v3704_v44 = vadd.f32 %v3659_v20, %v789_v41  ;;  %v3160_v41 = vld [vmem:[%s5149_s4 + $0x80] sm:$0xff] }
 0x24f   :  { %2854 = vmatmul.msk.bf16.gmra.mxu1 %vm420_vm0, %v3154_v40  ;;  %5258 = vst [vmem:[#allocation9_spill] sm:$0xff] %v3704_v44  ;;  %v1312_v48 = vmul.f32 %v1158_v16, %v3704_v44  ;;  %v3159_v16 = vld [vmem:[%s5149_s4 + $0x78] sm:$0xff]  ;;  %v3759_v18 = vpop.f32.mrf.mxu2 }
 0x254   :  { %v791_v45 = vpop.f32.mrf.mxu1 }
 0x255   :  { %v3707_v46 = vadd.f32 %v3659_v20, %v791_v45 }
 0x257   :  { %5259 = vst [vmem:[#allocation10_spill] sm:$0xff] %v3707_v46  ;;  %v1313_v49 = vmul.f32 %v1160_v19, %v3707_v46  ;;  %v3194_v19 = vld [vmem:[%s5150_s5 + $0x90] sm:$0xff] }
 0x258   :  { %1237 = vmatmul.bf16.gmra.mxu2 %v3194_v19 }
 0x259   :  { %v3713_v50 = vpack.c.bf16 %v1313_v49, %v1312_v48 }
 0x25c   :  { %v794_v52 = vpop.f32.mrf.mxu1 }
 0x25d   :  { %v3723_v55 = vadd.f32 %v3659_v20, %v794_v52 }
 0x25f   :  { %2855 = vmatmul.msk.bf16.gmra.mxu1 %vm420_vm0, %v3155_v51  ;;  %5260 = vst [vmem:[#allocation11_spill] sm:$0xff] %v3723_v55  ;;  %v1314_v59 = vmul.f32 %v1163_v25, %v3723_v55 }
 0x264   :  { %v796_v56 = vpop.f32.mrf.mxu1 }
 0x265   :  { %v3726_v57 = vadd.f32 %v3659_v20, %v796_v56  ;;  %v3195_v56 = vld [vmem:[%s5150_s5 + $0x98] sm:$0xff] }
 0x267   :  { %5261 = vst [vmem:[#allocation12_spill] sm:$0xff] %v3726_v57  ;;  %v1315_v60 = vmul.f32 %v1165_v31, %v3726_v57  ;;  %v3778_v31 = vpop.f32.mrf.mxu2 }
 0x268   :  { %1242 = vmatmul.bf16.gmra.mxu2 %v3195_v56 }
 0x269   :  { %v3730_v61 = vpack.c.bf16 %v1315_v60, %v1314_v59 }
 0x26c   :  { %v799_v63 = vpop.f32.mrf.mxu1 }
 0x26d   :  { %v3796_v51 = vadd.f32 %v3659_v20, %v799_v63 }
 0x26f   :  { %2856 = vmatmul.msk.bf16.gmra.mxu1 %vm420_vm0, %v3156_v62  ;;  %5269 = vst [vmem:[#allocation20_spill] sm:$0xff] %v3796_v51  ;;  %v1200_v54 = vpop.f32.mrf.mxu2  ;;  %v1316_v59 = vmul.f32 %v3688_v36, %v3796_v51 }
 0x274   :  { %v801_v2 = vpop.f32.mrf.mxu1 }
 0x275   :  { %v3792_v45 = vadd.f32 %v3659_v20, %v801_v2  ;;  %v3161_v2 = vld [vmem:[%s5149_s4 + $0x88] sm:$0xff] }
 0x277   :  { %5268 = vst [vmem:[#allocation19_spill] sm:$0xff] %v3792_v45 }
 0x27c   :  { %v804_v5 = vpop.f32.mrf.mxu1 }
 0x27d   :  { %v3785_v38 = vadd.f32 %v3659_v20, %v804_v5  ;;  %v3196_v5 = vld [vmem:[%s5150_s5 + $0xa0] sm:$0xff] }
 0x27e   :  { %1247 = vmatmul.bf16.gmra.mxu2 %v3196_v5  ;;  %v3166_v5 = vld [vmem:[%s5149_s4 + $0xb0] sm:$0xff] }
 0x27f   :  { %2857 = vmatmul.msk.bf16.gmra.mxu1 %vm420_vm0, %v3157_v4  ;;  %5267 = vst [vmem:[#allocation18_spill] sm:$0xff] %v3785_v38  ;;  %v1318_v52 = vmul.f32 %v3709_v47, %v3785_v38 }
 0x284   :  { %v806_v8 = vpop.f32.mrf.mxu1 }
 0x285   :  { %v3781_v32 = vadd.f32 %v3659_v20, %v806_v8 }
 0x287   :  { %5266 = vst [vmem:[#allocation17_spill] sm:$0xff] %v3781_v32  ;;  %v1319_v48 = vmul.f32 %v1175_v53, %v3781_v32 }
 0x289   :  { %v1377_v53 = vpack.c.bf16 %v1319_v48, %v1318_v52  ;;  %v3164_v52 = vld [vmem:[%s5149_s4 + $0xa0] sm:$0xff] }
 0x28c   :  { %v809_v11 = vpop.f32.mrf.mxu1 }
 0x28d   :  { %v3774_v27 = vadd.f32 %v3659_v20, %v809_v11 }
 0x28e   :  { %1252 = vmatmul.bf16.gmra.mxu2 %v3197_v13 }
 0x28f   :  { %2858 = vmatmul.msk.bf16.gmra.mxu1 %vm420_vm0, %v3158_v10  ;;  %5265 = vst [vmem:[#allocation16_spill] sm:$0xff] %v3774_v27  ;;  %v1320_v40 = vmul.f32 %v1178_v58, %v3774_v27  ;;  %v1317_v58 = vmul.f32 %v3697_v42, %v3792_v45  ;;  %v1203_v42 = vpop.f32.mrf.mxu2  ;;  %v3162_v10 = vld [vmem:[%s5149_s4 + $0x90] sm:$0xff] }
 0x291   :  { %v1376_v63 = vpack.c.bf16 %v1317_v58, %v1316_v59  ;;  %v3199_v58 = vld [vmem:[%s5150_s5 + $0xb8] sm:$0xff] }
 0x294   :  { %v811_v14 = vpop.f32.mrf.mxu1 }
 0x295   :  { %v3768_v25 = vadd.f32 %v3659_v20, %v811_v14 }
 0x297   :  { %5263 = vst [vmem:[#allocation14_spill] sm:$0xff] %v3768_v25  ;;  %v1321_v34 = vmul.f32 %v1180_v0, %v3768_v25  ;;  %v1205_v4 = vpop.f32.mrf.mxu2 }
 0x299   :  { %v1378_v49 = vpack.c.bf16 %v1321_v34, %v1320_v40 }
 0x29c   :  { %v814_v17 = vpop.f32.mrf.mxu1 }
 0x29d   :  { %v3765_v21 = vadd.f32 %v3659_v20, %v814_v17 }
 0x29f   :  { %2859 = vmatmul.msk.bf16.gmra.mxu1 %vm420_vm0, %v3159_v16  ;;  %5262 = vst [vmem:[#allocation13_spill] sm:$0xff] %v3765_v21  ;;  %v1322_v29 = vmul.f32 %v1183_v3, %v3765_v21 }
 0x2a4   :  { %v816_v23 = vpop.f32.mrf.mxu1 }
 0x2a5   :  { %v3771_v26 = vadd.f32 %v3659_v20, %v816_v23  ;;  %v3163_v23 = vld [vmem:[%s5149_s4 + $0x98] sm:$0xff] }
 0x2a7   :  { %5264 = vst [vmem:[#allocation15_spill] sm:$0xff] %v3771_v26  ;;  %v1323_v30 = vmul.f32 %v1185_v6, %v3771_v26 }
 0x2a9   :  { %v1379_v37 = vpack.c.bf16 %v1323_v30, %v1322_v29 }
 0x2ab   :  { %1564 = vmatpush.bf16.msra.mxu1 %v1379_v37  ;;  %3244 = vmatpush.bf16.msrb.mxu3 %v1379_v37 }
 0x2ac   :  { %v819_v43 = vpop.f32.mrf.mxu1 }
 0x2ad   :  { %v3809_v60 = vadd.f32 %v3659_v20, %v819_v43 }
 0x2af   :  { %2860 = vmatmul.msk.bf16.gmra.mxu1 %vm420_vm0, %v3160_v41  ;;  %3245 = vmatpush.bf16.msrb.mxu3 %v1378_v49  ;;  %5270 = vst [vmem:[#allocation21_spill] sm:$0xff] %v3809_v60  ;;  %v3815_v0 = vmul.f32 %v1188_v9, %v3809_v60  ;;  %v3846_v9 = vpop.f32.mrf.mxu2 }
 0x2b0   :  { %1565 = vmatpush.bf16.msra.mxu1 %v1378_v49 }
 0x2b3   :  { %3246 = vmatpush.bf16.msrb.mxu3 %v1377_v53 }
 0x2b4   :  { %1566 = vmatpush.bf16.msra.mxu1 %v1377_v53  ;;  %v821_v47 = vpop.f32.mrf.mxu1 }
 0x2b5   :  { %v3812_v62 = vadd.f32 %v3659_v20, %v821_v47  ;;  %v3165_v47 = vld [vmem:[%s5149_s4 + $0xa8] sm:$0xff] }
 0x2b7   :  { %5271 = vst [vmem:[#allocation22_spill] sm:$0xff] %v3812_v62  ;;  %3247 = vmatpush.bf16.msrb.mxu3 %v1376_v63  ;;  %v3818_v1 = vmul.f32 %v1190_v12, %v3812_v62  ;;  %v3859_v12 = vpop.f32.mrf.mxu2 }
 0x2b8   :  { %1567 = vmatpush.bf16.msra.mxu1 %v1376_v63 }
 0x2bb   :  { %3248 = vmatpush.bf16.msrb.mxu3 %v3730_v61 }
 0x2bc   :  { %1568 = vmatpush.bf16.msra.mxu1 %v3730_v61  ;;  %v824_v3 = vpop.f32.mrf.mxu1 }
 0x2bd   :  { %v3834_v6 = vadd.f32 %v3659_v20, %v824_v3 }
 0x2bf   :  { %2861 = vmatmul.msk.bf16.gmra.mxu1 %vm420_vm0, %v3161_v2  ;;  %3249 = vmatpush.bf16.msrb.mxu3 %v3713_v50  ;;  %5272 = vst [vmem:[#allocation23_spill] sm:$0xff] %v3834_v6  ;;  %v3843_v8 = vmul.f32 %v3753_v15, %v3834_v6  ;;  %v3874_v17 = vpop.f32.mrf.mxu2  ;;  %v3200_v2 = vld [vmem:[%s5150_s5 + $0xc0] sm:$0xff] }
 0x2c0   :  { %1569 = vmatpush.bf16.msra.mxu1 %v3713_v50 }
 0x2c3   :  { %3250 = vmatpush.bf16.msrb.mxu3 %v3692_v39 }
 0x2c4   :  { %1570 = vmatpush.bf16.msra.mxu1 %v3692_v39  ;;  %v826_v61 = vpop.f32.mrf.mxu1 }
 0x2c5   :  { %v3839_v7 = vadd.f32 %v3659_v20, %v826_v61 }
 0x2c7   :  { %5273 = vst [vmem:[#allocation24_spill] sm:$0xff] %v3839_v7  ;;  %3251 = vmatpush.bf16.msrb.mxu3 %v3673_v28  ;;  %v3850_v50 = vmul.f32 %v3759_v18, %v3839_v7  ;;  %v1215_v30 = vpop.f32.mrf.mxu2 }
 0x2c8   :  { %1571 = vmatpush.bf16.msra.mxu1 %v3673_v28 }
 0x2cc   :  { %v829_v11 = vpop.f32.mrf.mxu1 }
 0x2cd   :  { %v3865_v14 = vadd.f32 %v3659_v20, %v829_v11  ;;  %v3201_v11 = vld [vmem:[%s5150_s5 + $0xc8] sm:$0xff] }
 0x2cf   :  { %2862 = vmatmul.msk.bf16.gmra.mxu1 %vm420_vm0, %v3162_v10  ;;  %5274 = vst [vmem:[#allocation25_spill] sm:$0xff] %v3865_v14  ;;  %v3872_v16 = vmul.f32 %v3778_v31, %v3865_v14  ;;  %v3198_v31 = vld [vmem:[%s5150_s5 + $0xb0] sm:$0xff]  ;;  %v1218_v43 = vpop.f32.mrf.mxu2  ;;  %v3110_v14 = vld [vmem:[#allocation2 + $0xc8] sm:$0xf] }
 0x2d0   :  { %1257 = vmatmul.bf16.gmra.mxu2 %v3198_v31 }
 0x2d4   :  { %v831_v28 = vpop.f32.mrf.mxu1 }
 0x2d5   :  { %v3868_v15 = vadd.f32 %v3659_v20, %v831_v28 }
 0x2d7   :  { %5275 = vst [vmem:[#allocation26_spill] sm:$0xff] %v3868_v15  ;;  %v3877_v18 = vmul.f32 %v1200_v54, %v3868_v15  ;;  %v1220_v56 = vpop.f32.mrf.mxu2 }
 0x2dc   :  { %v834_v29 = vpop.f32.mrf.mxu1 }
 0x2dd   :  { %v3889_v34 = vadd.f32 %v3659_v20, %v834_v29 }
 0x2df   :  { %2863 = vmatmul.msk.bf16.gmra.mxu1 %vm420_vm0, %v3163_v23  ;;  %5276 = vst [vmem:[#allocation27_spill] sm:$0xff] %v3889_v34  ;;  %v3895_v41 = vmul.f32 %v1203_v42, %v3889_v34  ;;  %v1223_v59 = vpop.f32.mrf.mxu2  ;;  %v3167_v23 = vld [vmem:[%s5149_s4 + $0xb8] sm:$0xff]  ;;  %v3451_v34 = vmov 0  }
 0x2e0   :  { %1262 = vmatmul.bf16.gmra.mxu2 %v3199_v58  ;;  %3256 = vset.pattern.permute.xlu0 %v3451_v34 }
 0x2e1   :  { %3258 = vset.pattern.permute.xlu2 %v3451_v34  ;;  %3257 = vset.pattern.permute.xlu1 %v3451_v34  ;;  %v254_v34 = vld [vmem:[%s5152_s7 + $0x40] sm:$0xff] }
 0x2e4   :  { %v836_v37 = vpop.f32.mrf.mxu1 }
 0x2e5   :  { %v3892_v40 = vadd.f32 %v3659_v20, %v836_v37  ;;  %v3202_v37 = vld [vmem:[%s5150_s5 + $0xd0] sm:$0xff] }
 0x2e7   :  { %5277 = vst [vmem:[#allocation28_spill] sm:$0xff] %v3892_v40  ;;  %v3898_v48 = vmul.f32 %v1205_v4, %v3892_v40  ;;  %v1225_v42 = vpop.f32.mrf.mxu2 }
 0x2e9   :  { %v1383_v49 = vpack.c.bf16 %v3898_v48, %v3895_v41  ;;  %v5290_v41 = vpack.c.bf16 %v3850_v50, %v3843_v8  ;;  %v3170_v50 = vld [vmem:[%s5149_s4 + $0xd0] sm:$0xff] }
 0x2ea   :  { %v3230_v8 = vld [vmem:[#allocation2 + $0xac] sm:$0xf0] }
 0x2ec   :  { %v839_v54 = vpop.f32.mrf.mxu1 }
 0x2ef   :  { %2864 = vmatmul.msk.bf16.gmra.mxu1 %vm420_vm0, %v3164_v52  ;;  %v1228_v4 = vpop.f32.mrf.mxu2 }
 0x2f0   :  { %1267 = vmatmul.bf16.gmra.mxu2 %v3200_v2 }
 0x2f4   :  { %v841_v53 = vpop.f32.mrf.mxu1 }
 0x2f7   :  { %v1230_v10 = vpop.f32.mrf.mxu2 }
 0x2fc   :  { %v844_v63 = vpop.f32.mrf.mxu1 }
 0x2ff   :  { %2865 = vmatmul.msk.bf16.gmra.mxu1 %vm420_vm0, %v3165_v47  ;;  %v1233_v28 = vpop.f32.mrf.mxu2 }
 0x300   :  { %1272 = vmatmul.bf16.gmra.mxu2 %v3201_v11 }
 0x304   :  { %v846_v3 = vpop.f32.mrf.mxu1 }
 0x305   :  { %v3945_v39 = vadd.f32 %v3659_v20, %v846_v3 }
 0x307   :  { %v1235_v31 = vpop.f32.mrf.mxu2  ;;  %5282 = vst [vmem:[#allocation33_spill] sm:$0xff] %v3945_v39  ;;  %v1335_v3 = vmul.f32 %v1215_v30, %v3945_v39  ;;  %v3008_v39 = vld [vmem:[#allocation2 + $0x10] sm:$0xf0] }
 0x30c   :  { %v849_v61 = vpop.f32.mrf.mxu1 }
 0x30f   :  { %2866 = vmatmul.msk.bf16.gmra.mxu1 %vm420_vm0, %v3166_v5  ;;  %v3940_v5 = vadd.f32 %v3659_v20, %v849_v61  ;;  %v1238_v36 = vpop.f32.mrf.mxu2  ;;  %v3168_v61 = vld [vmem:[%s5149_s4 + $0xc0] sm:$0xff] }
 0x310   :  { %1277 = vmatmul.bf16.gmra.mxu2 %v3202_v37 }
 0x311   :  { %5281 = vst [vmem:[#allocation32_spill] sm:$0xff] %v3940_v5 }
 0x314   :  { %v851_v13 = vpop.f32.mrf.mxu1 }
 0x315   :  { %v3934_v47 = vadd.f32 %v3659_v20, %v851_v13  ;;  %v3949_v13 = vadd.f32 %v3659_v20, %v844_v63  ;;  %v3203_v63 = vld [vmem:[%s5150_s5 + $0xd8] sm:$0xff] }
 0x317   :  { %5279 = vst [vmem:[#allocation30_spill] sm:$0xff] %v3934_v47  ;;  %v1337_v37 = vmul.f32 %v1220_v56, %v3934_v47  ;;  %v1334_v56 = vmul.f32 %v3874_v17, %v3949_v13 }
 0x318   :  { %5283 = vst [vmem:[#allocation34_spill] sm:$0xff] %v3949_v13  ;;  %v3208_v13 = vld [vmem:[#allocation2 + $0x4] sm:$0xf] }
 0x31c   :  { %v854_v29 = vpop.f32.mrf.mxu1 }
 0x31d   :  { %v3931_v52 = vadd.f32 %v3659_v20, %v854_v29 }
 0x31f   :  { %2867 = vmatmul.msk.bf16.gmra.mxu1 %vm420_vm0, %v3167_v23  ;;  %5278 = vst [vmem:[#allocation29_spill] sm:$0xff] %v3931_v52  ;;  %v1338_v11 = vmul.f32 %v1223_v59, %v3931_v52 }
 0x320   :  { %1282 = vmatmul.bf16.gmra.mxu2 %v3203_v63  ;;  %v5292_v63 = vpack.c.bf16 %v3818_v1, %v3815_v0 }
 0x324   :  { %v856_v58 = vpop.f32.mrf.mxu1 }
 0x325   :  { %v3937_v2 = vadd.f32 %v3659_v20, %v856_v58  ;;  %v1336_v58 = vmul.f32 %v1218_v43, %v3940_v5  ;;  %v1240_v43 = vpop.f32.mrf.mxu2 }
 0x327   :  { %5280 = vst [vmem:[#allocation31_spill] sm:$0xff] %v3937_v2  ;;  %v1339_v23 = vmul.f32 %v1225_v42, %v3937_v2  ;;  %v3956_v42 = vadd.f32 %v3659_v20, %v841_v53  ;;  %v1386_v19 = vpack.c.bf16 %v1337_v37, %v1336_v58 }
 0x329   :  { %v1387_v29 = vpack.c.bf16 %v1339_v23, %v1338_v11  ;;  %5284 = vst [vmem:[#allocation35_spill] sm:$0xff] %v3956_v42  ;;  %v3960_v11 = vadd.f32 %v3659_v20, %v839_v54  ;;  %v1385_v23 = vpack.c.bf16 %v1335_v3, %v1334_v56  ;;  %v1333_v53 = vmul.f32 %v3859_v12, %v3956_v42  ;;  %v3204_v3 = vld [vmem:[%s5150_s5 + $0xe0] sm:$0xff] }
 0x32b   :  { %1613 = vmatpush.bf16.msrb.mxu0 %v1387_v29  ;;  %5285 = vst [vmem:[#allocation36_spill] sm:$0xff] %v3960_v11  ;;  %v1332_v30 = vmul.f32 %v3846_v9, %v3960_v11 }
 0x32c   :  { %v859_v59 = vpop.f32.mrf.mxu1 }
 0x32d   :  { %v3973_v54 = vadd.f32 %v3659_v20, %v859_v59  ;;  %v1384_v29 = vpack.c.bf16 %v1333_v53, %v1332_v30  ;;  %v1243_v12 = vpop.f32.mrf.mxu2 }
 0x32f   :  { %2868 = vmatmul.msk.bf16.gmra.mxu1 %vm420_vm0, %v3168_v61  ;;  %1614 = vmatpush.bf16.msrb.mxu0 %v1386_v19  ;;  %5286 = vst [vmem:[#allocation37_spill] sm:$0xff] %v3973_v54  ;;  %v3979_v37 = vmul.f32 %v1228_v4, %v3973_v54  ;;  %v3169_v61 = vld [vmem:[%s5149_s4 + $0xc8] sm:$0xff]  ;;  %v5288_v4 = vpack.c.bf16 %v3877_v18, %v3872_v16  ;;  %v3118_v54 = vld [vmem:[#allocation2 + $0xe0] sm:$0xf] }
 0x330   :  { %1287 = vmatmul.bf16.gmra.mxu2 %v3204_v3 }
 0x333   :  { %1615 = vmatpush.bf16.msrb.mxu0 %v1385_v23 }
 0x334   :  { %v861_v17 = vpop.f32.mrf.mxu1 }
 0x335   :  { %v3976_v19 = vadd.f32 %v3659_v20, %v861_v17 }
 0x337   :  { %5287 = vst [vmem:[#allocation38_spill] sm:$0xff] %v3976_v19  ;;  %v3982_v58 = vmul.f32 %v1230_v10, %v3976_v19  ;;  %1616 = vmatpush.bf16.msrb.mxu0 %v1384_v29  ;;  %v1245_v10 = vpop.f32.mrf.mxu2 }
 0x33b   :  { %1617 = vmatpush.bf16.msrb.mxu0 %v1383_v49 }
 0x33c   :  { %v864_v59 = vpop.f32.mrf.mxu1 }
 0x33d   :  { %v4000_v56 = vadd.f32 %v3659_v20, %v864_v59 }
 0x33f   :  { %2869 = vmatmul.msk.bf16.gmra.mxu1 %vm420_vm0, %v3169_v61  ;;  %1618 = vmatpush.bf16.msrb.mxu0 %v5288_v4  ;;  %5289 = vst [vmem:[#allocation39_spill] sm:$0xff] %v4000_v56  ;;  %v4009_v16 = vmul.f32 %v1233_v28, %v4000_v56  ;;  %v4017_v23 = vpop.f32.mrf.mxu2  ;;  %v3171_v4 = vld [vmem:[%s5149_s4 + $0xd8] sm:$0xff] }
 0x343   :  { %1619 = vmatpush.bf16.msrb.mxu0 %v5290_v41 }
 0x344   :  { %v866_v48 = vpop.f32.mrf.mxu1 }
 0x345   :  { %v4006_v49 = vadd.f32 %v3659_v20, %v866_v48 }
 0x347   :  { %5291 = vst [vmem:[#allocation40_spill] sm:$0xff] %v4006_v49  ;;  %v4012_v18 = vmul.f32 %v1235_v31, %v4006_v49  ;;  %1620 = vmatpush.bf16.msrb.mxu0 %v5292_v63  ;;  %v4025_v28 = vpop.f32.mrf.mxu2  ;;  %v3205_v31 = vld [vmem:[%s5150_s5 + $0xe8] sm:$0xff]  ;;  %v3234_v49 = vld [vmem:[#allocation2 + $0xcc] sm:$0xf0] }
 0x348   :  { %1292 = vmatmul.bf16.gmra.mxu2 %v3205_v31  ;;  %v3070_v31 = vld [vmem:[#allocation2 + $0x80] sm:$0xf] }
 0x34c   :  { %v869_v53 = vpop.f32.mrf.mxu1 }
 0x34d   :  { %v4031_v0 = vadd.f32 %v3659_v20, %v869_v53 }
 0x34f   :  { %2870 = vmatmul.msk.bf16.gmra.mxu1 %vm420_vm0, %v3170_v50  ;;  %5293 = vst [vmem:[#allocation41_spill] sm:$0xff] %v4031_v0  ;;  %v4037_v17 = vmul.f32 %v1238_v36, %v4031_v0  ;;  %v4042_v61 = vpop.f32.mrf.mxu2  ;;  %v3206_v36 = vld [vmem:[%s5150_s5 + $0xf0] sm:$0xff]  ;;  %v3102_v0 = vld [vmem:[#allocation2 + $0xc0] sm:$0xf] }
 0x354   :  { %v871_v1 = vpop.f32.mrf.mxu1 }
 0x355   :  { %v4034_v30 = vadd.f32 %v3659_v20, %v871_v1  ;;  %v3226_v1 = vld [vmem:[#allocation2 + $0x8c] sm:$0xf0] }
 0x356   :  { %v4067_v9 = vor.u32 %v3226_v1, %v3070_v31  ;;  %v3086_v1 = vld [vmem:[#allocation2 + $0xa0] sm:$0xf] }
 0x357   :  { %5294 = vst [vmem:[#allocation42_spill] sm:$0xff] %v4034_v30  ;;  %v4040_v29 = vmul.f32 %v1240_v43, %v4034_v30  ;;  %v4050_v41 = vpop.f32.mrf.mxu2  ;;  %v4079_v59 = vor.u32 %v3230_v8, %v3086_v1  ;;  %v3174_v8 = vld [vmem:[%s5149_s4 + $0xf0] sm:$0xff] }
 0x358   :  { %1297 = vmatmul.bf16.gmra.mxu2 %v3206_v36  ;;  %5297 = vst [vmem:[#allocation45_spill] sm:$0xff] %v4067_v9  ;;  %1592 = vmatmul.bf16.vlgmr.msrb.gmra.mxu3 %v4067_v9  ;;  %v3172_v36 = vld [vmem:[%s5149_s4 + $0xe0] sm:$0xff] }
 0x359   :  { %5298 = vst [vmem:[#allocation46_spill] sm:$0xff] %v4079_v59 }
 0x35c   :  { %v874_v3 = vpop.f32.mrf.mxu1 }
 0x35d   :  { %v4056_v43 = vadd.f32 %v3659_v20, %v874_v3  ;;  %v3173_v3 = vld [vmem:[%s5149_s4 + $0xe8] sm:$0xff] }
 0x35f   :  { %2871 = vmatmul.msk.bf16.gmra.mxu1 %vm420_vm0, %v3171_v4  ;;  %5295 = vst [vmem:[#allocation43_spill] sm:$0xff] %v4056_v43  ;;  %v4062_v50 = vmul.f32 %v1243_v12, %v4056_v43  ;;  %v1258_v4 = vpop.f32.mrf.mxu2  ;;  %v3207_v12 = vld [vmem:[%s5150_s5 + $0xf8] sm:$0xff] }
 0x364   :  { %v876_v48 = vpop.f32.mrf.mxu1 }
 0x365   :  { %v4059_v63 = vadd.f32 %v3659_v20, %v876_v48 }
 0x367   :  { %5296 = vst [vmem:[#allocation44_spill] sm:$0xff] %v4059_v63  ;;  %v4065_v53 = vmul.f32 %v1245_v10, %v4059_v63  ;;  %v1260_v10 = vpop.f32.mrf.mxu2 }
 0x368   :  { %1302 = vmatmul.bf16.gmra.mxu2 %v3207_v12  ;;  %1597 = vmatmul.bf16.gmra.mxu3 %v4079_v59  ;;  %v4086_v12 = vor.u32 %v3234_v49, %v3102_v0  ;;  %v3175_v49 = vld [vmem:[%s5149_s4 + $0xf8] sm:$0xff] }
 0x36a   :  { %5299 = vst [vmem:[#allocation47_spill] sm:$0xff] %v4086_v12 }
 0x36c   :  { %v879_v48 = vpop.f32.mrf.mxu1 }
 0x36f   :  { %2872 = vmatmul.msk.bf16.gmra.mxu1 %vm420_vm0, %v3172_v36  ;;  %v1263_v43 = vpop.f32.mrf.mxu2 }
 0x374   :  { %v881_v31 = vpop.f32.mrf.mxu1 }
 0x377   :  { %v1265_v30 = vpop.f32.mrf.mxu2 }
 0x378   :  { %1602 = vmatmul.bf16.gmra.mxu3 %v4086_v12 }
 0x37c   :  { %v884_v63 = vpop.f32.mrf.mxu1 }
 0x37f   :  { %2873 = vmatmul.msk.bf16.gmra.mxu1 %vm420_vm0, %v3173_v3  ;;  %v4093_v56 = vpop.f32.mrf.mxu2  ;;  %v3238_v3 = vld [vmem:[#allocation2 + $0xec] sm:$0xf0] }
 0x380   :  { %v4095_v11 = vor.u32 %v3238_v3, %v3118_v54 }
 0x382   :  { %5300 = vst [vmem:[#allocation48_spill] sm:$0xff] %v4095_v11 }
 0x384   :  { %v886_v36 = vpop.f32.mrf.mxu1 }
 0x387   :  { %v4097_v42 = vpop.f32.mrf.mxu2 }
 0x388   :  { %1607 = vmatmul.bf16.gmra.mxu3 %v4095_v11 }
 0x38c   :  { %v889_v1 = vpop.f32.mrf.mxu1 }
 0x38d   :  { %v4119_v47 = vadd.f32 %v3659_v20, %v889_v1 }
 0x38f   :  { %2874 = vmatmul.msk.bf16.gmra.mxu1 %vm420_vm0, %v3174_v8  ;;  %v4104_v8 = vor.u32 %v3208_v13, %v3008_v39  ;;  %v4110_v5 = vpop.f32.mrf.mxu2  ;;  %5305 = vst [vmem:[#allocation53_spill] sm:$0xff] %v4119_v47 }
 0x391   :  { %5301 = vst [vmem:[#allocation49_spill] sm:$0xff] %v4104_v8  ;;  %1621 = vmatmul.bf16.vlgmr.msrb.gmra.mxu0 %v4104_v8  ;;  %v3210_v8 = vld [vmem:[#allocation2 + $0xc] sm:$0xf0] }
 0x394   :  { %v891_v19 = vpop.f32.mrf.mxu1 }
 0x395   :  { %v4113_v12 = vadd.f32 %v3659_v20, %v891_v19  ;;  %v4128_v19 = vadd.f32 %v3659_v20, %v884_v63  ;;  %v4143_v63 = vadd.f32 %v3659_v20, %v879_v48 }
 0x397   :  { %5303 = vst [vmem:[#allocation51_spill] sm:$0xff] %v4113_v12  ;;  %v1353_v2 = vmul.f32 %v1260_v10, %v4113_v12  ;;  %v3212_v10 = vld [vmem:[#allocation2 + $0x24] sm:$0xf] }
 0x398   :  { %5307 = vst [vmem:[#allocation55_spill] sm:$0xff] %v4128_v19 }
 0x399   :  { %5310 = vst [vmem:[#allocation58_spill] sm:$0xff] %v4143_v63 }
 0x39c   :  { %v894_v0 = vpop.f32.mrf.mxu1 }
 0x39d   :  { %v4108_v54 = vadd.f32 %v3659_v20, %v894_v0  ;;  %v4124_v0 = vadd.f32 %v3659_v20, %v886_v36 }
 0x39f   :  { %2875 = vmatmul.msk.bf16.gmra.mxu1 %vm420_vm0, %v3175_v49  ;;  %5302 = vst [vmem:[#allocation50_spill] sm:$0xff] %v4108_v54  ;;  %v1354_v39 = vmul.f32 %v1263_v43, %v4108_v54  ;;  %v3006_v49 = vld [vmem:[#allocation2] sm:$0xf]  ;;  %v1351_v43 = vmul.f32 %v4050_v41, %v4124_v0  ;;  %v3232_v54 = vld [vmem:[#allocation2 + $0xc4] sm:$0xf] }
 0x3a0   :  { %5306 = vst [vmem:[#allocation54_spill] sm:$0xff] %v4124_v0  ;;  %v4131_v1 = vor.u32 %v3210_v8, %v3006_v49  ;;  %v3214_v49 = vld [vmem:[#allocation2 + $0x2c] sm:$0xf0]  ;;  %v3223_v0 = vld [vmem:[#allocation2 + $0x74] sm:$0xf0] }
 0x3a2   :  { %5308 = vst [vmem:[#allocation56_spill] sm:$0xff] %v4131_v1 }
 0x3a4   :  { %v896_v3 = vpop.f32.mrf.mxu1 }
 0x3a5   :  { %v4116_v11 = vadd.f32 %v3659_v20, %v896_v3  ;;  %v1352_v3 = vmul.f32 %v1258_v4, %v4119_v47 }
 0x3a7   :  { %5304 = vst [vmem:[#allocation52_spill] sm:$0xff] %v4116_v11  ;;  %v1355_v13 = vmul.f32 %v1265_v30, %v4116_v11  ;;  %v4136_v30 = vadd.f32 %v3659_v20, %v881_v31  ;;  %v1394_v36 = vpack.c.bf16 %v1353_v2, %v1352_v3  ;;  %v4140_v11 = vpop.f32.mrf.mxu2  ;;  %v1348_v2 = vmul.f32 %v4017_v23, %v4143_v63 }
 0x3a8   :  { %v5312_v3 = vpack.c.bf16 %v4065_v53, %v4062_v50  ;;  %v5314_v23 = vpack.c.bf16 %v4040_v29, %v4037_v17  ;;  %v5316_v50 = vpack.c.bf16 %v4012_v18, %v4009_v16  ;;  %v3014_v53 = vld [vmem:[#allocation2 + $0x8] sm:$0xf]  ;;  %v5318_v17 = vpack.c.bf16 %v3982_v58, %v3979_v37  ;;  %v3038_v29 = vld [vmem:[#allocation2 + $0x40] sm:$0xf]  ;;  %v3220_v18 = vld [vmem:[#allocation2 + $0x64] sm:$0xf] }
 0x3a9   :  { %v1395_v52 = vpack.c.bf16 %v1355_v13, %v1354_v39  ;;  %5309 = vst [vmem:[#allocation57_spill] sm:$0xff] %v4136_v30  ;;  %v3024_v39 = vld [vmem:[#allocation2 + $0x30] sm:$0xf0]  ;;  %v1349_v31 = vmul.f32 %v4025_v28, %v4136_v30  ;;  %v3022_v13 = vld [vmem:[#allocation2 + $0x20] sm:$0xf] }
 0x3aa   :  { %v4148_v4 = vor.u32 %v3212_v10, %v3024_v39  ;;  %v4162_v28 = vor.u32 %v3214_v49, %v3022_v13  ;;  %v3040_v10 = vld [vmem:[#allocation2 + $0x50] sm:$0xf0]  ;;  %v3030_v37 = vld [vmem:[#allocation2 + $0x28] sm:$0xf]  ;;  %v3215_v58 = vld [vmem:[#allocation2 + $0x34] sm:$0xf0] }
 0x3ab   :  { %1662 = vmatpush.bf16.msra.mxu3 %v1395_v52  ;;  %v1350_v52 = vmul.f32 %v4042_v61, %v4128_v19  ;;  %v1392_v8 = vpack.c.bf16 %v1349_v31, %v1348_v2  ;;  %v3211_v31 = vld [vmem:[#allocation2 + $0x14] sm:$0xf0]  ;;  %v3088_v19 = vld [vmem:[#allocation2 + $0xb0] sm:$0xf0] }
 0x3ac   :  { %v4133_v59 = vpop.f32.mrf.mxu1  ;;  %5311 = vst [vmem:[#allocation59_spill] sm:$0xff] %v4148_v4  ;;  %1626 = vmatmul.bf16.gmra.mxu0 %v4148_v4  ;;  %v4180_v2 = vor.u32 %v3211_v31, %v3014_v53  ;;  %v3054_v53 = vld [vmem:[#allocation2 + $0x60] sm:$0xf]  ;;  %v3222_v31 = vld [vmem:[#allocation2 + $0x6c] sm:$0xf0] }
 0x3ad   :  { %v1393_v41 = vpack.c.bf16 %v1351_v43, %v1350_v52  ;;  %5313 = vst [vmem:[#allocation60_spill] sm:$0xff] %v4162_v28 }
 0x3ae   :  { %5317 = vst [vmem:[#allocation62_spill] sm:$0xff] %v4180_v2 }
 0x3af   :  { %1663 = vmatpush.bf16.msra.mxu3 %v1394_v36  ;;  %1572 = vmatmul.bf16.vlgmr.msra.gmra.mxu1 %v4131_v1  ;;  %v4157_v61 = vpop.f32.mrf.mxu2  ;;  %v3216_v36 = vld [vmem:[#allocation2 + $0x44] sm:$0xf]  ;;  %v3235_v1 = vld [vmem:[#allocation2 + $0xd4] sm:$0xf0] }
 0x3b0   :  { %v4170_v39 = vor.u32 %v3216_v36, %v3040_v10  ;;  %v4272_v7 = vor.u32 %v3235_v1, %v3110_v14 }
 0x3b2   :  { %5315 = vst [vmem:[#allocation61_spill] sm:$0xff] %v4170_v39 }
 0x3b3   :  { %1664 = vmatpush.bf16.msra.mxu3 %v1393_v41  ;;  %5334 = vst [vmem:[#allocation78_spill] sm:$0xff] %v4272_v7 }
 0x3b4   :  { %v4155_v48 = vpop.f32.mrf.mxu1 }
 0x3b7   :  { %1665 = vmatpush.bf16.msra.mxu3 %v1392_v8  ;;  %v4173_v52 = vpop.f32.mrf.mxu2  ;;  %v3218_v8 = vld [vmem:[#allocation2 + $0x4c] sm:$0xf0] }
 0x3b8   :  { %v4186_v13 = vor.u32 %v3218_v8, %v3038_v29  ;;  %v3224_v8 = vld [vmem:[#allocation2 + $0x84] sm:$0xf] }
 0x3ba   :  { %5319 = vst [vmem:[#allocation63_spill] sm:$0xff] %v4186_v13 }
 0x3bb   :  { %1666 = vmatpush.bf16.msra.mxu3 %v5312_v3  ;;  %v3056_v3 = vld [vmem:[#allocation2 + $0x70] sm:$0xf0] }
 0x3bc   :  { %v4164_v43 = vpop.f32.mrf.mxu1  ;;  %1631 = vmatmul.bf16.gmra.mxu0 %v4170_v39  ;;  %v4193_v36 = vor.u32 %v3220_v18, %v3056_v3  ;;  %v3072_v18 = vld [vmem:[#allocation2 + $0x90] sm:$0xf0] }
 0x3bd   :  { %v4208_v3 = vor.u32 %v3224_v8, %v3072_v18  ;;  %v3062_v18 = vld [vmem:[#allocation2 + $0x68] sm:$0xf] }
 0x3be   :  { %5320 = vst [vmem:[#allocation64_spill] sm:$0xff] %v4193_v36 }
 0x3bf   :  { %1667 = vmatpush.bf16.msra.mxu3 %v5314_v23  ;;  %1577 = vmatmul.bf16.gmra.mxu1 %v4162_v28  ;;  %v4190_v16 = vpop.f32.mrf.mxu2  ;;  %v4198_v23 = vor.u32 %v3215_v58, %v3030_v37  ;;  %5323 = vst [vmem:[#allocation67_spill] sm:$0xff] %v4208_v3  ;;  %v3046_v37 = vld [vmem:[#allocation2 + $0x48] sm:$0xf]  ;;  %v3219_v58 = vld [vmem:[#allocation2 + $0x54] sm:$0xf0] }
 0x3c0   :  { %v4215_v30 = vor.u32 %v3219_v58, %v3046_v37  ;;  %v4229_v37 = vor.u32 %v3223_v0, %v3062_v18 }
 0x3c1   :  { %5321 = vst [vmem:[#allocation65_spill] sm:$0xff] %v4198_v23 }
 0x3c2   :  { %5324 = vst [vmem:[#allocation68_spill] sm:$0xff] %v4215_v30 }
 0x3c3   :  { %1668 = vmatpush.bf16.msra.mxu3 %v5316_v50  ;;  %5326 = vst [vmem:[#allocation70_spill] sm:$0xff] %v4229_v37 }
 0x3c4   :  { %v4178_v41 = vpop.f32.mrf.mxu1 }
 0x3c7   :  { %1669 = vmatpush.bf16.msra.mxu3 %v5318_v17  ;;  %v4200_v50 = vpop.f32.mrf.mxu2  ;;  %v4203_v17 = vor.u32 %v3222_v31, %v3054_v53 }
 0x3c9   :  { %5322 = vst [vmem:[#allocation66_spill] sm:$0xff] %v4203_v17 }
 0x3ca   :  { %1670 = vmatmul.bf16.vlgmr.msra.gmra.mxu3 %v4180_v2 }
 0x3cc   :  { %v4188_v49 = vpop.f32.mrf.mxu1  ;;  %1636 = vmatmul.bf16.gmra.mxu0 %v4193_v36  ;;  %v3104_v36 = vld [vmem:[#allocation2 + $0xd0] sm:$0xf0] }
 0x3cf   :  { %1582 = vmatmul.bf16.gmra.mxu1 %v4186_v13  ;;  %v4210_v2 = vpop.f32.mrf.mxu2 }
 0x3d4   :  { %v4196_v10 = vpop.f32.mrf.mxu1 }
 0x3d7   :  { %v4218_v53 = vpop.f32.mrf.mxu2 }
 0x3da   :  { %1675 = vmatmul.bf16.gmra.mxu3 %v4198_v23  ;;  %v3228_v23 = vld [vmem:[#allocation2 + $0xa4] sm:$0xf] }
 0x3db   :  { %v4222_v8 = vor.u32 %v3228_v23, %v3088_v19  ;;  %v4234_v19 = vor.u32 %v3232_v54, %v3104_v36  ;;  %v3078_v23 = vld [vmem:[#allocation2 + $0x88] sm:$0xf] }
 0x3dc   :  { %v4205_v29 = vpop.f32.mrf.mxu1  ;;  %1641 = vmatmul.bf16.gmra.mxu0 %v4208_v3  ;;  %v3094_v36 = vld [vmem:[#allocation2 + $0xa8] sm:$0xf] }
 0x3dd   :  { %5325 = vst [vmem:[#allocation69_spill] sm:$0xff] %v4222_v8 }
 0x3de   :  { %5327 = vst [vmem:[#allocation71_spill] sm:$0xff] %v4234_v19 }
 0x3df   :  { %1587 = vmatmul.bf16.gmra.mxu1 %v4203_v17  ;;  %v4227_v3 = vpop.f32.mrf.mxu2  ;;  %v3120_v17 = vld [vmem:[#allocation2 + $0xf0] sm:$0xf0] }
 0x3e4   :  { %v4213_v63 = vpop.f32.mrf.mxu1 }
 0x3e7   :  { %v1295_v12 = vpop.f32.mrf.mxu2 }
 0x3ea   :  { %1680 = vmatmul.bf16.gmra.mxu3 %v4215_v30  ;;  %v4232_v30 = vpop.f32.mrf.mxu3 }
 0x3ec   :  { %v4220_v31 = vpop.f32.mrf.mxu1  ;;  %1646 = vmatmul.bf16.gmra.mxu0 %v4222_v8  ;;  %v3227_v8 = vld [vmem:[#allocation2 + $0x94] sm:$0xf0] }
 0x3ed   :  { %v4237_v4 = vor.u32 %v3227_v8, %v3078_v23  ;;  %v260_v8 = vld [vmem:[%s5152_s7 + $0x70] sm:$0xff] }
 0x3ee   :  { %1832 = vperm.xlu0 %3256, %v260_v8  }
 0x3ef   :  { %5328 = vst [vmem:[#allocation72_spill] sm:$0xff] %v4237_v4  ;;  %v1298_v0 = vpop.f32.mrf.mxu2 }
 0x3f2   :  { %v4239_v9 = vpop.f32.mrf.mxu3 }
 0x3f4   :  { %v4225_v47 = vpop.f32.mrf.mxu1 }
 0x3f7   :  { %v1300_v54 = vpop.f32.mrf.mxu2 }
 0x3fa   :  { %1685 = vmatmul.bf16.gmra.mxu3 %v4229_v37  ;;  %v3236_v37 = vld [vmem:[#allocation2 + $0xe4] sm:$0xf]  ;;  %v4244_v40 = vpop.f32.mrf.mxu3 }
 0x3fb   :  { %v4242_v13 = vor.u32 %v3236_v37, %v3120_v17  ;;  %v261_v37 = vld [vmem:[%s5152_s7 + $0x78] sm:$0xff] }
 0x3fc   :  { %v924_v58 = vpop.f32.mrf.mxu1  ;;  %1651 = vmatmul.bf16.gmra.mxu0 %v4234_v19  ;;  %v3231_v19 = vld [vmem:[#allocation2 + $0xb4] sm:$0xf0]  ;;  %1837 = vperm.xlu0 %3256, %v261_v37  }
 0x3fd   :  { %5329 = vst [vmem:[#allocation73_spill] sm:$0xff] %v4242_v13 }
 0x402   :  { %v4253_v17 = vpop.f32.mrf.mxu3 }
 0x404   :  { %v926_v39 = vpop.f32.mrf.mxu1  ;;  %1802 = vperm.xlu0 %3256, %v254_v34   ;;  %v4285_v34 = vadd.f32 %v3659_v20, %v924_v58  ;;  %v253_v58 = vld [vmem:[%s5152_s7 + $0x38] sm:$0xff] }
 0x405   :  { %v4280_v60 = vadd.f32 %v3659_v20, %v926_v39 }
 0x406   :  { %5337 = vst [vmem:[#allocation81_spill] sm:$0xff] %v4285_v34 }
 0x407   :  { %5336 = vst [vmem:[#allocation80_spill] sm:$0xff] %v4280_v60  ;;  %v1367_v39 = vmul.f32 %v1295_v12, %v4280_v60 }
 0x40a   :  { %1690 = vmatmul.bf16.gmra.mxu3 %v4237_v4  ;;  %v4250_v4 = vor.u32 %v3231_v19, %v3094_v36 }
 0x40c   :  { %v929_v18 = vpop.f32.mrf.mxu1  ;;  %1656 = vmatmul.bf16.gmra.mxu0 %v4242_v13  ;;  %5330 = vst [vmem:[#allocation74_spill] sm:$0xff] %v4250_v4  ;;  %v1303_v13 = vpop.f32.mrf.mxu2  ;;  %1797 = vperm.xlu0 %3256, %v253_v58  }
 0x40e   :  { %v1622_v51 = vpop.f32.mrf.mxu0 }
 0x414   :  { %v931_v23 = vpop.f32.mrf.mxu1  ;;  %v1305_v37 = vpop.f32.mrf.mxu2 }
 0x415   :  { %v4265_v36 = vadd.f32 %v3659_v20, %v931_v23 }
 0x417   :  { %5332 = vst [vmem:[#allocation76_spill] sm:$0xff] %v4265_v36  ;;  %v1369_v23 = vmul.f32 %v1300_v54, %v4265_v36  ;;  %v3112_v36 = vld [vmem:[#allocation2 + $0xd8] sm:$0xf0] }
 0x41a   :  { %1695 = vmatmul.bf16.gmra.mxu3 %v4250_v4  ;;  %v4270_v4 = vpop.f32.mrf.mxu3 }
 0x41c   :  { %v934_v28 = vpop.f32.mrf.mxu1 }
 0x41d   :  { %v4259_v15 = vadd.f32 %v3659_v20, %v934_v28  ;;  %v4275_v28 = vadd.f32 %v3659_v20, %v929_v18 }
 0x41f   :  { %5331 = vst [vmem:[#allocation75_spill] sm:$0xff] %v4259_v15  ;;  %v1370_v6 = vmul.f32 %v1303_v13, %v4259_v15  ;;  %v1368_v14 = vmul.f32 %v1298_v0, %v4275_v28  ;;  %v4290_v13 = vadd.f32 %v3659_v20, %v4225_v47  ;;  %v4306_v47 = vadd.f32 %v3659_v20, %v4220_v31 }
 0x420   :  { %5335 = vst [vmem:[#allocation79_spill] sm:$0xff] %v4275_v28  ;;  %v4314_v0 = vadd.f32 %v3659_v20, %v4213_v63  ;;  %v4320_v31 = vadd.f32 %v3659_v20, %v4205_v29  ;;  %v4328_v63 = vadd.f32 %v3659_v20, %v4196_v10  ;;  %v259_v29 = vld [vmem:[%s5152_s7 + $0x68] sm:$0xff] }
 0x421   :  { %5338 = vst [vmem:[#allocation82_spill] sm:$0xff] %v4290_v13  ;;  %v1402_v18 = vpack.c.bf16 %v1369_v23, %v1368_v14  ;;  %v1365_v54 = vmul.f32 %v4218_v53, %v4290_v13  ;;  %v3239_v14 = vld [vmem:[#allocation2 + $0xf4] sm:$0xf0]  ;;  %v3229_v28 = vld [vmem:[#allocation2 + $0xac] sm:$0xf] }
 0x422   :  { %5339 = vst [vmem:[#allocation83_spill] sm:$0xff] %v4306_v47  ;;  %v4310_v12 = vpop.f32.mrf.mxu3  ;;  %v1363_v53 = vmul.f32 %v4200_v50, %v4314_v0  ;;  %v1362_v50 = vmul.f32 %v4190_v16, %v4320_v31  ;;  %v1361_v58 = vmul.f32 %v4173_v52, %v4328_v63 }
 0x423   :  { %5340 = vst [vmem:[#allocation84_spill] sm:$0xff] %v4314_v0 }
 0x424   :  { %v936_v19 = vpop.f32.mrf.mxu1  ;;  %5341 = vst [vmem:[#allocation85_spill] sm:$0xff] %v4320_v31 }
 0x425   :  { %v4268_v8 = vadd.f32 %v3659_v20, %v936_v19  ;;  %5342 = vst [vmem:[#allocation86_spill] sm:$0xff] %v4328_v63  ;;  %v3389_v20 = vld [vmem:[%s5154_s9] ss:$0 sm:$0xff] }
 0x426   :  { %v4347_v10 = vadd.f32 %v3389_v20, %v4188_v49  ;;  %v4360_v49 = vadd.f32 %v3389_v20, %v4164_v43  ;;  %v252_v43 = vld [vmem:[%s5152_s7 + $0x30] sm:$0xff] }
 0x427   :  { %5333 = vst [vmem:[#allocation77_spill] sm:$0xff] %v4268_v8  ;;  %v1371_v62 = vmul.f32 %v1305_v37, %v4268_v8 }
 0x428   :  { %5344 = vst [vmem:[#allocation88_spill] sm:$0xff] %v4347_v10  ;;  %v1360_v16 = vmul.f32 %v4157_v61, %v4347_v10  ;;  %v247_v61 = vld [vmem:[%s5152_s7 + $0x8] sm:$0xff] }
 0x429   :  { %v1403_v19 = vpack.c.bf16 %v1371_v62, %v1370_v6  ;;  %v258_v62 = vld [vmem:[%s5152_s7 + $0x60] sm:$0xff]  ;;  %v256_v6 = vld [vmem:[%s5152_s7 + $0x50] sm:$0xff]  ;;  %5346 = vst [vmem:[#allocation90_spill] sm:$0xff] %v4360_v49 }
 0x42a   :  { %1700 = vmatmul.bf16.gmra.mxu3 %v4272_v7  ;;  %1822 = vperm.xlu1 %3257, %v258_v62   ;;  %v248_v62 = vld [vmem:[%s5152_s7 + $0x10] sm:$0xff]  ;;  %v3233_v7 = vld [vmem:[#allocation2 + $0xcc] sm:$0xf] }
 0x42b   :  { %1711 = vmatpush.bf16.msra.mxu0 %v1403_v19  ;;  %1812 = vperm.xlu2 %3258, %v256_v6   ;;  %v3126_v19 = vld [vmem:[#allocation2 + $0xe8] sm:$0xf]  ;;  %v4352_v6 = vadd.f32 %v3389_v20, %v4178_v41 }
 0x42c   :  { %v1573_v1 = vpop.f32.mrf.mxu1  ;;  %1772 = vperm.xlu0 %3256, %v248_v62  }
 0x42d   :  { %v4293_v37 = vadd.f32 %v1622_v51, %v1573_v1  ;;  %v1366_v51 = vmul.f32 %v4227_v3, %v4285_v34  ;;  %v1364_v3 = vmul.f32 %v4210_v2, %v4306_v47  ;;  %v4324_v1 = vpop.f32.mrf.mxu0  ;;  %v257_v2 = vld [vmem:[%s5152_s7 + $0x58] sm:$0xff]  ;;  %5345 = vst [vmem:[#allocation89_spill] sm:$0xff] %v4352_v6  ;;  %v1359_v41 = vmul.f32 %v4140_v11, %v4352_v6 }
 0x42e   :  { %v1358_v11 = vmul.f32 %v4110_v5, %v4360_v49  ;;  %v251_v5 = vld [vmem:[%s5152_s7 + $0x28] sm:$0xff] }
 0x42f   :  { %1712 = vmatpush.bf16.msra.mxu0 %v1402_v18  ;;  %v1401_v23 = vpack.c.bf16 %v1367_v39, %v1366_v51  ;;  %v1400_v39 = vpack.c.bf16 %v1365_v54, %v1364_v3  ;;  %v4332_v18 = vor.u32 %v3239_v14, %v3126_v19  ;;  %v1399_v51 = vpack.c.bf16 %v1363_v53, %v1362_v50  ;;  %v4356_v54 = vpop.f32.mrf.mxu3  ;;  %v255_v19 = vld [vmem:[%s5152_s7 + $0x48] sm:$0xff] }
 0x430   :  { %v1398_v3 = vpack.c.bf16 %v1361_v58, %v1360_v16  ;;  %v1397_v53 = vpack.c.bf16 %v1359_v41, %v1358_v11  ;;  %v249_v16 = vld [vmem:[%s5152_s7 + $0x18] sm:$0xff]  ;;  %v246_v41 = vld [vmem:[%s5152_s7] sm:$0xff] }
 0x431   :  { %5343 = vst [vmem:[#allocation87_spill] sm:$0xff] %v4332_v18 }
 0x432   :  { %1827 = vperm.xlu1 %3257, %v259_v29  }
 0x433   :  { %1713 = vmatpush.bf16.msra.mxu0 %v1401_v23  ;;  %1817 = vperm.xlu2 %3258, %v257_v2   ;;  %v4365_v23 = vadd.f32 %v3389_v20, %v4155_v48  ;;  %v4379_v48 = vadd.f32 %v3389_v20, %v4133_v59  ;;  %v3209_v2 = vld [vmem:[#allocation2 + $0xc] sm:$0xf]  ;;  %v3016_v59 = vld [vmem:[#allocation2 + $0x18] sm:$0xf0] }
 0x434   :  { %1767 = vperm.xlu0 %3256, %v247_v61   ;;  %v4389_v20 = vor.u32 %v3209_v2, %v3016_v59  ;;  %v3032_v61 = vld [vmem:[#allocation2 + $0x38] sm:$0xf0] }
 0x435   :  { %5347 = vst [vmem:[#allocation91_spill] sm:$0xff] %v4365_v23  ;;  %v1627_v52 = vpop.f32.mrf.mxu0  ;;  %v1357_v14 = vmul.f32 %v4097_v42, %v4365_v23  ;;  %v250_v42 = vld [vmem:[%s5152_s7 + $0x20] sm:$0xff] }
 0x436   :  { %5348 = vst [vmem:[#allocation92_spill] sm:$0xff] %v4379_v48 }
 0x437   :  { %1714 = vmatpush.bf16.msra.mxu0 %v1400_v39  ;;  %v1356_v39 = vmul.f32 %v4093_v56, %v4379_v48  ;;  %v4387_v29 = vpop.f32.mrf.mxu3  ;;  %5349 = vst [vmem:[#allocation93_spill] sm:$0xff] %v4389_v20  ;;  %v4399_v56 = vpop.f32.mrf.mxu1 }
 0x439   :  { %v1396_v62 = vpack.c.bf16 %v1357_v14, %v1356_v39 }
 0x43a   :  { %1705 = vmatmul.bf16.gmra.mxu3 %v4332_v18  ;;  %1807 = vperm.xlu1 %3257, %v255_v19   ;;  %v3064_v18 = vld [vmem:[#allocation2 + $0x78] sm:$0xf0] }
 0x43b   :  { %1715 = vmatpush.bf16.msra.mxu0 %v1399_v51  ;;  %1792 = vperm.xlu2 %3258, %v252_v43   ;;  %v3213_v43 = vld [vmem:[#allocation2 + $0x2c] sm:$0xf] }
 0x43c   :  { %v4413_v14 = vor.u32 %v3213_v43, %v3032_v61 }
 0x43d   :  { %v4397_v50 = vpop.f32.mrf.mxu0 }
 0x43e   :  { %5350 = vst [vmem:[#allocation94_spill] sm:$0xff] %v4413_v14 }
 0x43f   :  { %1716 = vmatpush.bf16.msra.mxu0 %v1398_v3  ;;  %v1578_v19 = vpop.f32.mrf.mxu1 }
 0x442   :  { %1782 = vperm.xlu1 %3257, %v250_v42  }
 0x443   :  { %1717 = vmatpush.bf16.msra.mxu0 %v1397_v53  ;;  %1787 = vperm.xlu2 %3258, %v251_v5   ;;  %v1628_v53 = vadd.f32 %v1627_v52, %v1578_v19  ;;  %v3048_v5 = vld [vmem:[#allocation2 + $0x58] sm:$0xf0]  ;;  %v3221_v19 = vld [vmem:[#allocation2 + $0x6c] sm:$0xf] }
 0x445   :  { %v1632_v3 = vpop.f32.mrf.mxu0 }
 0x447   :  { %1718 = vmatpush.bf16.msra.mxu0 %v1396_v62  ;;  %v4418_v39 = vpop.f32.mrf.mxu1  ;;  %v3217_v62 = vld [vmem:[#allocation2 + $0x4c] sm:$0xf] }
 0x44a   :  { %1719 = vmatmul.bf16.vlgmr.msra.gmra.mxu0 %v4389_v20  ;;  %1777 = vperm.xlu1 %3257, %v249_v16   ;;  %v4422_v16 = vor.u32 %v3217_v62, %v3048_v5 }
 0x44b   :  { %1762 = vperm.xlu2 %3258, %v246_v41  }
 0x44c   :  { %5351 = vst [vmem:[#allocation95_spill] sm:$0xff] %v4422_v16 }
 0x44d   :  { %v1671_v58 = vpop.f32.mrf.mxu3 }
 0x44e   :  { %v4403_v51 = vadd.f32 %v1671_v58, %v4293_v37  ;;  %v4416_v37 = vpop.f32.mrf.mxu0 }
 0x44f   :  { %v1583_v41 = vpop.f32.mrf.mxu1 }
 0x450   :  { %v1633_v43 = vadd.f32 %v1632_v3, %v1583_v41  ;;  %v3225_v41 = vld [vmem:[#allocation2 + $0x8c] sm:$0xf] }
 0x455   :  { %v4411_v11 = vpop.f32.mrf.mxu3 }
 0x456   :  { %v1637_v58 = vpop.f32.mrf.mxu0 }
 0x457   :  { %v4427_v52 = vpop.f32.mrf.mxu1 }
 0x45a   :  { %1724 = vmatmul.bf16.gmra.mxu0 %v4413_v14 }
 0x45d   :  { %v1676_v2 = vpop.f32.mrf.mxu3 }
 0x45e   :  { %v1677_v59 = vadd.f32 %v1676_v2, %v1628_v53  ;;  %v4425_v20 = vpop.f32.mrf.mxu0  ;;  %v4431_v2 = vor.u32 %v3221_v19, %v3064_v18 }
 0x45f   :  { %v1588_v62 = vpop.f32.mrf.mxu1 }
 0x460   :  { %5352 = vst [vmem:[#allocation96_spill] sm:$0xff] %v4431_v2  ;;  %v1638_v5 = vadd.f32 %v1637_v58, %v1588_v62  ;;  %v3096_v58 = vld [vmem:[#allocation2 + $0xb8] sm:$0xf0]  ;;  %v4472_v23 = vpop.permute.xlu0 %1832 }
 0x461   :  { %v4444_v62 = vor.u32 %v3229_v28, %v3096_v58 }
 0x463   :  { %5354 = vst [vmem:[#allocation98_spill] sm:$0xff] %v4444_v62 }
 0x465   :  { %v4420_v42 = vpop.f32.mrf.mxu3 }
 0x466   :  { %v1642_v47 = vpop.f32.mrf.mxu0 }
 0x467   :  { %v1643_v18 = vadd.f32 %v1642_v47, %v4232_v30  ;;  %v3237_v30 = vld [vmem:[#allocation2 + $0xec] sm:$0xf]  ;;  %v3128_v47 = vld [vmem:[#allocation2 + $0xf8] sm:$0xf0] }
 0x468   :  { %v4450_v8 = vor.u32 %v3237_v30, %v3128_v47 }
 0x46a   :  { %1729 = vmatmul.bf16.gmra.mxu0 %v4422_v16  ;;  %5356 = vst [vmem:[#allocation100_spill] sm:$0xff] %v4450_v8 }
 0x46d   :  { %v1681_v61 = vpop.f32.mrf.mxu3 }
 0x46e   :  { %v1682_v14 = vadd.f32 %v1681_v61, %v1633_v43  ;;  %v4434_v3 = vpop.f32.mrf.mxu0  ;;  %v3080_v43 = vld [vmem:[#allocation2 + $0x98] sm:$0xf0] }
 0x46f   :  { %v4438_v34 = vor.u32 %v3225_v41, %v3080_v43  ;;  %v4447_v41 = vor.u32 %v3233_v7, %v3112_v36 }
 0x471   :  { %5353 = vst [vmem:[#allocation97_spill] sm:$0xff] %v4438_v34 }
 0x472   :  { %5355 = vst [vmem:[#allocation99_spill] sm:$0xff] %v4447_v41 }
 0x475   :  { %v4429_v53 = vpop.f32.mrf.mxu3 }
 0x476   :  { %v4442_v19 = vpop.f32.mrf.mxu0 }
 0x47a   :  { %1734 = vmatmul.bf16.gmra.mxu0 %v4431_v2 }
 0x47d   :  { %v1686_v13 = vpop.f32.mrf.mxu3 }
 0x47e   :  { %v1687_v16 = vadd.f32 %v1686_v13, %v1638_v5  ;;  %v1649_v13 = vpop.f32.mrf.mxu0 }
 0x47f   :  { %v1650_v33 = vadd.f32 %v1649_v13, %v4253_v17 }
 0x485   :  { %v4436_v61 = vpop.f32.mrf.mxu3  ;;  %v4478_v45 = vpop.permute.xlu2 %1812 }
 0x486   :  { %v1652_v5 = vpop.f32.mrf.mxu0 }
 0x487   :  { %v1653_v46 = vadd.f32 %v1652_v5, %v4270_v4  ;;  %v1645_v4 = vadd.f32 %v4434_v3, %v4239_v9 }
 0x48a   :  { %1739 = vmatmul.bf16.gmra.mxu0 %v4438_v34 }
 0x48d   :  { %v1691_v60 = vpop.f32.mrf.mxu3  ;;  %v4486_v21 = vpop.permute.xlu2 %1817 }
 0x48e   :  { %v1692_v2 = vadd.f32 %v1691_v60, %v1643_v18  ;;  %v1654_v43 = vpop.f32.mrf.mxu0 }
 0x48f   :  { %v1655_v26 = vadd.f32 %v1654_v43, %v4310_v12  ;;  %v1648_v12 = vadd.f32 %v4442_v19, %v4244_v40  ;;  %v1635_v19 = vadd.f32 %v4416_v37, %v4427_v52  ;;  %v1630_v37 = vadd.f32 %v4397_v50, %v4418_v39 }
 0x490   :  { %v1625_v50 = vadd.f32 %v4324_v1, %v4399_v56 }
 0x496   :  { %v1657_v34 = vpop.f32.mrf.mxu0 }
 0x49a   :  { %1744 = vmatmul.bf16.gmra.mxu0 %v4444_v62 }
 0x49c   :  { %v4474_v48 = vpop.permute.xlu1 %1822 }
 0x49e   :  { %v1659_v60 = vpop.f32.mrf.mxu0 }
 0x49f   :  { %v1660_v44 = vadd.f32 %v1659_v60, %v4387_v29  ;;  %v1684_v60 = vadd.f32 %v4429_v53, %v1635_v19  ;;  %v3396_v19 = vld [vmem:[%s5150_s5 + $0x30] sm:$0xff] }
 0x4aa   :  { %1749 = vmatmul.bf16.gmra.mxu0 %v4447_v41 }
 0x4ba   :  { %1754 = vmatmul.bf16.gmra.mxu0 %v4450_v8  ;;  %v1693_v8 = vpop.f32.mrf.mxu3 }
 0x4c2   :  { %v1696_v63 = vpop.f32.mrf.mxu3 }
 0x4c7   :  { %v1720_v28 = vpop.f32.mrf.mxu0 }
 0x4c8   :  { %v4454_v18 = vadd.f32 %v1720_v28, %v4403_v51 }
 0x4cf   :  { %v4456_v58 = vpop.f32.mrf.mxu0 }
 0x4d7   :  { %v1725_v62 = vpop.f32.mrf.mxu0 }
 0x4d8   :  { %v4458_v7 = vadd.f32 %v1725_v62, %v1677_v59  ;;  %v1698_v59 = vpop.f32.mrf.mxu3 }
 0x4d9   :  { %v1699_v43 = vadd.f32 %v1698_v59, %v1650_v33 }
 0x4df   :  { %v4460_v36 = vpop.f32.mrf.mxu0 }
 0x4e0   :  { %v1701_v6 = vpop.f32.mrf.mxu3 }
 0x4e1   :  { %v1702_v24 = vadd.f32 %v1701_v6, %v1653_v46 }
 0x4e7   :  { %v1730_v41 = vpop.f32.mrf.mxu0 }
 0x4e8   :  { %v4462_v15 = vadd.f32 %v1730_v41, %v1682_v14  ;;  %v1703_v14 = vpop.f32.mrf.mxu3 }
 0x4e9   :  { %v1704_v35 = vadd.f32 %v1703_v14, %v1655_v26  ;;  %v1697_v26 = vadd.f32 %v1696_v63, %v1648_v12 }
 0x4ef   :  { %v4464_v0 = vpop.f32.mrf.mxu0 }
 0x4f0   :  { %v1706_v38 = vpop.f32.mrf.mxu3 }
 0x4f7   :  { %v1735_v30 = vpop.f32.mrf.mxu0 }
 0x4f8   :  { %v4466_v47 = vadd.f32 %v1735_v30, %v1687_v16  ;;  %v4476_v16 = vpop.permute.xlu0 %1837  ;;  %v1708_v57 = vpop.f32.mrf.mxu3 }
 0x4f9   :  { %v1709_v22 = vadd.f32 %v1708_v57, %v1660_v44  ;;  %v1590_v44 = vpop.f32.mrf.mxu1 }
 0x4ff   :  { %v4468_v31 = vpop.f32.mrf.mxu0 }
 0x500   :  { %v4483_v27 = vpop.permute.xlu0 %1802 }
 0x507   :  { %v1740_v51 = vpop.f32.mrf.mxu0 }
 0x508   :  { %v4470_v28 = vadd.f32 %v1740_v51, %v1692_v2  ;;  %v4480_v2 = vpop.permute.xlu1 %1827  ;;  %v1658_v51 = vadd.f32 %v1657_v34, %v4356_v54  ;;  %v4500_v57 = vpop.permute.xlu0 %1797 }
 0x50a   :  { %v1707_v25 = vadd.f32 %v1706_v38, %v1658_v51 }
 0x50f   :  { %v1742_v10 = vpop.f32.mrf.mxu0 }
 0x510   :  { %v4491_v54 = vpop.permute.xlu1 %1807  ;;  %v4518_v59 = vpop.permute.xlu0 %1772 }
 0x517   :  { %v1745_v62 = vpop.f32.mrf.mxu0 }
 0x518   :  { %v1746_v17 = vadd.f32 %v1745_v62, %v1697_v26  ;;  %v4509_v3 = vpop.permute.xlu1 %1782  ;;  %v4540_v56 = vpop.permute.xlu0 %1767 }
 0x51a   :  { %v1850_v6 = vmul.f32 %v4478_v45, %v1746_v17 }
 0x51f   :  { %v1747_v49 = vpop.f32.mrf.mxu0 }
 0x520   :  { %v1748_v29 = vadd.f32 %v1747_v49, %v1699_v43 }
 0x522   :  { %v1851_v9 = vmul.f32 %v4486_v21, %v1748_v29 }
 0x527   :  { %v1750_v41 = vpop.f32.mrf.mxu0 }
 0x52f   :  { %v1752_v30 = vpop.f32.mrf.mxu0 }
 0x530   :  { %v1753_v34 = vadd.f32 %v1752_v30, %v1704_v35  ;;  %v1679_v30 = vadd.f32 %v4420_v42, %v1630_v37  ;;  %v1674_v42 = vadd.f32 %v4411_v11, %v1625_v50 }
 0x532   :  { %v1853_v46 = vmul.f32 %v4480_v2, %v1753_v34 }
 0x537   :  { %v1755_v32 = vpop.f32.mrf.mxu0 }
 0x538   :  { %v1756_v55 = vadd.f32 %v1755_v32, %v1707_v25  ;;  %v1751_v25 = vadd.f32 %v1750_v41, %v1702_v24  ;;  %v4503_v24 = vpop.permute.xlu2 %1792 }
 0x53a   :  { %v1854_v38 = vmul.f32 %v4472_v23, %v1756_v55  ;;  %v1694_v55 = vadd.f32 %v1693_v8, %v1645_v4  ;;  %v1852_v40 = vmul.f32 %v4474_v48, %v1751_v25  ;;  %v1723_v25 = vadd.f32 %v4456_v58, %v1674_v42  ;;  %v5361_v42 = vld [vmem:[#allocation9_spill] sm:$0xff] }
 0x53b   :  { %v1842_v4 = vmul.f32 %v4518_v59, %v4458_v7 }
 0x53c   :  { %3261 = vtanh.f32 %v1854_v38  ;;  %v1743_v33 = vadd.f32 %v1742_v10, %v1694_v55  ;;  %v4533_v38 = vpop.permute.xlu1 %1777  ;;  %v1841_v26 = vmul.f32 %v4540_v56, %v1723_v25 }
 0x53f   :  { %v1757_v51 = vpop.f32.mrf.mxu0 }
 0x540   :  { %v1758_v32 = vadd.f32 %v1757_v51, %v1709_v22  ;;  %v1640_v22 = vadd.f32 %v4425_v20, %v1590_v44  ;;  %v1849_v20 = vmul.f32 %v4491_v54, %v1743_v33  ;;  %v4524_v14 = vpop.permute.xlu2 %1787 }
 0x542   :  { %v1855_v35 = vmul.f32 %v4476_v16, %v1758_v32  ;;  %v1689_v63 = vadd.f32 %v4436_v61, %v1640_v22  ;;  %v3262_v49 = vpop.eup %3261  ;;  %v1848_v61 = vmul.f32 %v4483_v27, %v4470_v28  ;;  %v1846_v28 = vmul.f32 %v4503_v24, %v4466_v47 }
 0x543   :  { %v1844_v47 = vmul.f32 %v4509_v3, %v4462_v15 }
 0x544   :  { %3263 = vtanh.f32 %v1855_v35  ;;  %v1738_v13 = vadd.f32 %v4468_v31, %v1689_v63  ;;  %v1733_v31 = vadd.f32 %v4464_v0, %v1684_v60  ;;  %v1728_v0 = vadd.f32 %v4460_v36, %v1679_v30  ;;  %v3392_v63 = vld [vmem:[%s5150_s5 + $0x10] sm:$0xff]  ;;  %v5357_v60 = vld [vmem:[#allocation5_spill] sm:$0xff] }
 0x545   :  { %3265 = vtanh.f32 %v1853_v46  ;;  %v5359_v30 = vld [vmem:[#allocation7_spill] sm:$0xff] }
 0x546   :  { %3267 = vtanh.f32 %v1852_v40  ;;  %v1847_v52 = vmul.f32 %v4500_v57, %v1738_v13  ;;  %v1845_v39 = vmul.f32 %v4524_v14, %v1733_v31  ;;  %v1843_v1 = vmul.f32 %v4533_v38, %v1728_v0  ;;  %v3397_v13 = vld [vmem:[%s5150_s5 + $0x38] sm:$0xff] }
 0x547   :  { %3269 = vtanh.f32 %v1851_v9  ;;  %v3390_v9 = vld [vmem:[%s5150_s5] sm:$0xff] }
 0x548   :  { %3271 = vtanh.f32 %v1850_v6  ;;  %v4544_v11 = vpop.permute.xlu2 %1762  ;;  %v3393_v6 = vld [vmem:[%s5150_s5 + $0x18] sm:$0xff] }
 0x549   :  { %3273 = vtanh.f32 %v1849_v20  ;;  %v1840_v46 = vmul.f32 %v4544_v11, %v4454_v18  ;;  %v3391_v18 = vld [vmem:[%s5150_s5 + $0x8] sm:$0xff]  ;;  %v3398_v20 = vld [vmem:[%s5150_s5 + $0x40] sm:$0xff] }
 0x54a   :  { %v3264_v8 = vpop.eup %3263  ;;  %3275 = vtanh.f32 %v1848_v61 }
 0x54b   :  { %v1879_v10 = vpack.c.bf16 %v3264_v8, %v3262_v49  ;;  %v3266_v5 = vpop.eup %3265  ;;  %3277 = vtanh.f32 %v1847_v52  ;;  %v3394_v49 = vld [vmem:[%s5150_s5 + $0x20] sm:$0xff]  ;;  %v3395_v8 = vld [vmem:[%s5150_s5 + $0x28] sm:$0xff] }
 0x54c   :  { %v3268_v62 = vpop.eup %3267  ;;  %3279 = vtanh.f32 %v1846_v28  ;;  %v3399_v52 = vld [vmem:[%s5150_s5 + $0x48] sm:$0xff] }
 0x54d   :  { %1880 = vmatpush.bf16.msrb.mxu3 %v1879_v10  ;;  %v1878_v41 = vpack.c.bf16 %v3266_v5, %v3268_v62  ;;  %v3270_v53 = vpop.eup %3269  ;;  %3281 = vtanh.f32 %v1845_v39  ;;  %v5358_v62 = vld [vmem:[#allocation6_spill] sm:$0xff]  ;;  %v3400_v39 = vld [vmem:[%s5150_s5 + $0x50] sm:$0xff] }
 0x54e   :  { %v3272_v34 = vpop.eup %3271  ;;  %3283 = vtanh.f32 %v1844_v47 }
 0x54f   :  { %v1877_v51 = vpack.c.bf16 %v3270_v53, %v3272_v34  ;;  %v3274_v12 = vpop.eup %3273  ;;  %3285 = vtanh.f32 %v1843_v1  ;;  %v5360_v34 = vld [vmem:[#allocation8_spill] sm:$0xff] }
 0x550   :  { %v3276_v43 = vpop.eup %3275  ;;  %3287 = vtanh.f32 %v1842_v4 }
 0x551   :  { %1881 = vmatpush.bf16.msrb.mxu3 %v1878_v41  ;;  %v1876_v36 = vpack.c.bf16 %v3274_v12, %v3276_v43  ;;  %v3278_v32 = vpop.eup %3277  ;;  %3289 = vtanh.f32 %v1841_v26  ;;  %v5362_v43 = vld [vmem:[#allocation10_spill] sm:$0xff] }
 0x552   :  { %v3280_v15 = vpop.eup %3279  ;;  %3291 = vtanh.f32 %v1840_v46 }
 0x553   :  { %v1875_v29 = vpack.c.bf16 %v3278_v32, %v3280_v15  ;;  %v3282_v58 = vpop.eup %3281  ;;  %v5363_v15 = vld [vmem:[#allocation11_spill] sm:$0xff] }
 0x554   :  { %v3284_v35 = vpop.eup %3283 }
 0x555   :  { %1882 = vmatpush.bf16.msrb.mxu3 %v1877_v51  ;;  %v1874_v44 = vpack.c.bf16 %v3282_v58, %v3284_v35  ;;  %v3286_v55 = vpop.eup %3285  ;;  %v3402_v35 = vld [vmem:[%s5150_s5 + $0x60] sm:$0xff] }
 0x556   :  { %v3288_v7 = vpop.eup %3287 }
 0x557   :  { %v1873_v17 = vpack.c.bf16 %v3286_v55, %v3288_v7  ;;  %v3290_v40 = vpop.eup %3289  ;;  %v3403_v7 = vld [vmem:[%s5150_s5 + $0x68] sm:$0xff] }
 0x558   :  { %v3292_v22 = vpop.eup %3291 }
 0x559   :  { %1883 = vmatpush.bf16.msrb.mxu3 %v1876_v36  ;;  %v1872_v33 = vpack.c.bf16 %v3290_v40, %v3292_v22  ;;  %v3401_v36 = vld [vmem:[%s5150_s5 + $0x58] sm:$0xff]  ;;  %v3404_v22 = vld [vmem:[%s5150_s5 + $0x70] sm:$0xff] }
 0x55d   :  { %1884 = vmatpush.bf16.msrb.mxu3 %v1875_v29  ;;  %v5364_v29 = vld [vmem:[#allocation12_spill] sm:$0xff] }
 0x561   :  { %1885 = vmatpush.bf16.msrb.mxu3 %v1874_v44 }
 0x565   :  { %1886 = vmatpush.bf16.msrb.mxu3 %v1873_v17 }
 0x569   :  { %1887 = vmatpush.bf16.msrb.mxu3 %v1872_v33 }
 0x56c   :  { %1888 = vmatmul.bf16.vlgmr.msrb.gmra.mxu3 %v3390_v9 }
 0x57c   :  { %1893 = vmatmul.bf16.gmra.mxu3 %v3391_v18  ;;  %v3405_v18 = vld [vmem:[%s5150_s5 + $0x78] sm:$0xff] }
 0x58c   :  { %1898 = vmatmul.bf16.gmra.mxu3 %v3392_v63 }
 0x59c   :  { %1903 = vmatmul.bf16.gmra.mxu3 %v3393_v6 }
 0x5ac   :  { %1908 = vmatmul.bf16.gmra.mxu3 %v3394_v49  ;;  %v5365_v49 = vld [vmem:[#allocation13_spill] sm:$0xff] }
 0x5bc   :  { %1913 = vmatmul.bf16.gmra.mxu3 %v3395_v8 }
 0x5cc   :  { %1918 = vmatmul.bf16.gmra.mxu3 %v3396_v19  ;;  %v5366_v19 = vld [vmem:[#allocation15_spill] sm:$0xff] }
 0x5dc   :  { %1923 = vmatmul.bf16.gmra.mxu3 %v3397_v13 }
 0x5ec   :  { %1928 = vmatmul.bf16.gmra.mxu3 %v3398_v20  ;;  %v5367_v20 = vld [vmem:[#allocation14_spill] sm:$0xff] }
 0x5ef   :  { %v1889_v10 = vpop.f32.mrf.mxu3 }
 0x5f0   :  { %v4577_v61 = vmul.f32 %v1889_v10, %v5357_v60  ;;  %v5368_v60 = vld [vmem:[#allocation16_spill] sm:$0xff] }
 0x5f7   :  { %v1891_v5 = vpop.f32.mrf.mxu3 }
 0x5f8   :  { %v4580_v37 = vmul.f32 %v1891_v5, %v5358_v62 }
 0x5fa   :  { %v2113_v31 = vpack.c.bf16 %v4580_v37, %v4577_v61  ;;  %v3409_v61 = vld [vmem:[%s5150_s5 + $0x98] sm:$0xff] }
 0x5fc   :  { %1933 = vmatmul.bf16.gmra.mxu3 %v3399_v52  ;;  %v3406_v52 = vld [vmem:[%s5150_s5 + $0x80] sm:$0xff] }
 0x5ff   :  { %v1894_v41 = vpop.f32.mrf.mxu3 }
 0x600   :  { %v2051_v28 = vmul.f32 %v1894_v41, %v5359_v30  ;;  %v5369_v41 = vld [vmem:[#allocation17_spill] sm:$0xff] }
 0x607   :  { %v1896_v53 = vpop.f32.mrf.mxu3 }
 0x608   :  { %v2052_v50 = vmul.f32 %v1896_v53, %v5360_v34  ;;  %v5370_v34 = vld [vmem:[#allocation18_spill] sm:$0xff] }
 0x60a   :  { %v2114_v0 = vpack.c.bf16 %v2052_v50, %v2051_v28 }
 0x60c   :  { %1938 = vmatmul.bf16.gmra.mxu3 %v3400_v39  ;;  %v5371_v39 = vld [vmem:[#allocation19_spill] sm:$0xff] }
 0x60f   :  { %v1899_v51 = vpop.f32.mrf.mxu3 }
 0x610   :  { %v2053_v47 = vmul.f32 %v1899_v51, %v5361_v42  ;;  %v5372_v42 = vld [vmem:[#allocation20_spill] sm:$0xff] }
 0x617   :  { %v1901_v12 = vpop.f32.mrf.mxu3 }
 0x618   :  { %v2054_v25 = vmul.f32 %v1901_v12, %v5362_v43 }
 0x61a   :  { %v2115_v1 = vpack.c.bf16 %v2054_v25, %v2053_v47 }
 0x61c   :  { %1943 = vmatmul.bf16.gmra.mxu3 %v3401_v36  ;;  %v5373_v36 = vld [vmem:[#allocation21_spill] sm:$0xff] }
 0x61f   :  { %v1904_v32 = vpop.f32.mrf.mxu3 }
 0x620   :  { %v2055_v26 = vmul.f32 %v1904_v32, %v5363_v15 }
 0x627   :  { %v1906_v4 = vpop.f32.mrf.mxu3 }
 0x628   :  { %v2056_v58 = vmul.f32 %v1906_v4, %v5364_v29  ;;  %v5374_v4 = vld [vmem:[#allocation22_spill] sm:$0xff] }
 0x629   :  { %v3407_v29 = vld [vmem:[%s5150_s5 + $0x88] sm:$0xff] }
 0x62a   :  { %v2116_v46 = vpack.c.bf16 %v2056_v58, %v2055_v26 }
 0x62c   :  { %1948 = vmatmul.bf16.gmra.mxu3 %v3402_v35 }
 0x62f   :  { %v1909_v44 = vpop.f32.mrf.mxu3 }
 0x630   :  { %v2057_v47 = vmul.f32 %v1909_v44, %v5372_v42  ;;  %v5375_v44 = vld [vmem:[#allocation23_spill] sm:$0xff]  ;;  %v3413_v42 = vld [vmem:[%s5150_s5 + $0xb8] sm:$0xff] }
 0x637   :  { %v1911_v55 = vpop.f32.mrf.mxu3 }
 0x638   :  { %v2058_v51 = vmul.f32 %v1911_v55, %v5371_v39 }
 0x63a   :  { %v2117_v43 = vpack.c.bf16 %v2058_v51, %v2057_v47 }
 0x63c   :  { %1953 = vmatmul.bf16.gmra.mxu3 %v3403_v7  ;;  %v5376_v7 = vld [vmem:[#allocation24_spill] sm:$0xff] }
 0x63f   :  { %v1914_v17 = vpop.f32.mrf.mxu3 }
 0x640   :  { %v2059_v50 = vmul.f32 %v1914_v17, %v5370_v34  ;;  %v5385_v34 = vld [vmem:[#allocation45_spill] sm:$0xff] }
 0x647   :  { %v1916_v40 = vpop.f32.mrf.mxu3 }
 0x648   :  { %v2060_v53 = vmul.f32 %v1916_v40, %v5369_v41  ;;  %v5384_v41 = vld [vmem:[#allocation66_spill] sm:$0xff] }
 0x64a   :  { %v2118_v12 = vpack.c.bf16 %v2060_v53, %v2059_v50  ;;  %v3411_v53 = vld [vmem:[%s5150_s5 + $0xa8] sm:$0xff]  ;;  %v3412_v50 = vld [vmem:[%s5150_s5 + $0xb0] sm:$0xff] }
 0x64c   :  { %1958 = vmatmul.bf16.gmra.mxu3 %v3404_v22  ;;  %v5377_v22 = vld [vmem:[#allocation56_spill] sm:$0xff] }
 0x64f   :  { %v1919_v33 = vpop.f32.mrf.mxu3 }
 0x650   :  { %v2061_v62 = vmul.f32 %v1919_v33, %v5368_v60  ;;  %v5378_v33 = vld [vmem:[#allocation25_spill] sm:$0xff] }
 0x651   :  { %v3410_v60 = vld [vmem:[%s5150_s5 + $0xa0] sm:$0xff] }
 0x657   :  { %v1921_v9 = vpop.f32.mrf.mxu3 }
 0x658   :  { %v2062_v10 = vmul.f32 %v1921_v9, %v5367_v20 }
 0x65a   :  { %v2119_v30 = vpack.c.bf16 %v2062_v10, %v2061_v62 }
 0x65c   :  { %1963 = vmatmul.bf16.gmra.mxu3 %v3405_v18  ;;  %v5379_v18 = vld [vmem:[#allocation26_spill] sm:$0xff] }
 0x65f   :  { %v1924_v63 = vpop.f32.mrf.mxu3 }
 0x660   :  { %v2063_v8 = vmul.f32 %v1924_v63, %v5365_v49  ;;  %v5380_v49 = vld [vmem:[#allocation60_spill] sm:$0xff] }
 0x667   :  { %v1926_v6 = vpop.f32.mrf.mxu3 }
 0x668   :  { %v2064_v13 = vmul.f32 %v1926_v6, %v5366_v19 }
 0x66a   :  { %v2120_v5 = vpack.c.bf16 %v2064_v13, %v2063_v8  ;;  %v5381_v8 = vld [vmem:[#allocation27_spill] sm:$0xff]  ;;  %v5382_v13 = vld [vmem:[#allocation28_spill] sm:$0xff] }
 0x66c   :  { %1968 = vmatmul.bf16.gmra.mxu3 %v3406_v52  ;;  %2145 = vmatpush.bf16.msrb.mxu0 %v2120_v5  ;;  %v5383_v5 = vld [vmem:[#allocation63_spill] sm:$0xff] }
 0x66f   :  { %v1929_v28 = vpop.f32.mrf.mxu3 }
 0x670   :  { %2146 = vmatpush.bf16.msrb.mxu0 %v2119_v30  ;;  %v4623_v32 = vmul.f32 %v1929_v28, %v5373_v36 }
 0x674   :  { %2147 = vmatpush.bf16.msrb.mxu0 %v2118_v12  ;;  %v5386_v12 = vld [vmem:[#allocation46_spill] sm:$0xff] }
 0x677   :  { %v1931_v25 = vpop.f32.mrf.mxu3 }
 0x678   :  { %v4626_v15 = vmul.f32 %v1931_v25, %v5374_v4  ;;  %2148 = vmatpush.bf16.msrb.mxu0 %v2117_v43  ;;  %v5387_v25 = vld [vmem:[#allocation29_spill] sm:$0xff]  ;;  %v5388_v4 = vld [vmem:[#allocation31_spill] sm:$0xff] }
 0x67a   :  { %v2121_v26 = vpack.c.bf16 %v4626_v15, %v4623_v32  ;;  %v3417_v32 = vld [vmem:[%s5150_s5 + $0xd8] sm:$0xff] }
 0x67c   :  { %1973 = vmatmul.bf16.gmra.mxu3 %v3407_v29  ;;  %2149 = vmatpush.bf16.msrb.mxu0 %v2116_v46 }
 0x67f   :  { %v1934_v58 = vpop.f32.mrf.mxu3 }
 0x680   :  { %2150 = vmatpush.bf16.msrb.mxu0 %v2115_v1  ;;  %v4634_v55 = vmul.f32 %v1934_v58, %v5375_v44  ;;  %v5389_v58 = vld [vmem:[#allocation30_spill] sm:$0xff] }
 0x684   :  { %2151 = vmatpush.bf16.msrb.mxu0 %v2114_v0  ;;  %v3408_v0 = vld [vmem:[%s5150_s5 + $0x90] sm:$0xff] }
 0x687   :  { %v1936_v35 = vpop.f32.mrf.mxu3 }
 0x688   :  { %v4637_v17 = vmul.f32 %v1936_v35, %v5376_v7  ;;  %2152 = vmatpush.bf16.msrb.mxu0 %v2113_v31  ;;  %v5390_v7 = vld [vmem:[#allocation47_spill] sm:$0xff] }
 0x68a   :  { %v2122_v40 = vpack.c.bf16 %v4637_v17, %v4634_v55  ;;  %v3416_v55 = vld [vmem:[%s5150_s5 + $0xd0] sm:$0xff] }
 0x68b   :  { %2153 = vmatmul.bf16.vlgmr.msrb.gmra.mxu0 %v5377_v22  ;;  %v5391_v22 = vld [vmem:[#allocation32_spill] sm:$0xff] }
 0x68c   :  { %1978 = vmatmul.bf16.gmra.mxu3 %v3408_v0 }
 0x68f   :  { %v1939_v1 = vpop.f32.mrf.mxu3 }
 0x690   :  { %v2069_v9 = vmul.f32 %v1939_v1, %v5378_v33  ;;  %v3414_v1 = vld [vmem:[%s5150_s5 + $0xc0] sm:$0xff] }
 0x697   :  { %v1941_v46 = vpop.f32.mrf.mxu3 }
 0x698   :  { %v2070_v63 = vmul.f32 %v1941_v46, %v5379_v18  ;;  %v5392_v46 = vld [vmem:[#allocation33_spill] sm:$0xff] }
 0x69a   :  { %v2123_v6 = vpack.c.bf16 %v2070_v63, %v2069_v9  ;;  %v5393_v63 = vld [vmem:[#allocation34_spill] sm:$0xff] }
 0x69b   :  { %2158 = vmatmul.bf16.gmra.mxu0 %v5380_v49 }
 0x69c   :  { %1983 = vmatmul.bf16.gmra.mxu3 %v3409_v61  ;;  %v5394_v61 = vld [vmem:[#allocation35_spill] sm:$0xff] }
 0x69f   :  { %v1944_v37 = vpop.f32.mrf.mxu3 }
 0x6a0   :  { %v2071_v19 = vmul.f32 %v1944_v37, %v5381_v8  ;;  %v5395_v8 = vld [vmem:[#allocation36_spill] sm:$0xff] }
 0x6a7   :  { %v1946_v31 = vpop.f32.mrf.mxu3 }
 0x6a8   :  { %v2072_v20 = vmul.f32 %v1946_v31, %v5382_v13 }
 0x6aa   :  { %v2124_v10 = vpack.c.bf16 %v2072_v20, %v2071_v19 }
 0x6ab   :  { %2163 = vmatmul.bf16.gmra.mxu0 %v5383_v5  ;;  %v5396_v5 = vld [vmem:[#allocation37_spill] sm:$0xff] }
 0x6ac   :  { %1988 = vmatmul.bf16.gmra.mxu3 %v3410_v60 }
 0x6af   :  { %v1949_v62 = vpop.f32.mrf.mxu3 }
 0x6b0   :  { %v2073_v19 = vmul.f32 %v1949_v62, %v5395_v8 }
 0x6b7   :  { %v1951_v52 = vpop.f32.mrf.mxu3 }
 0x6b8   :  { %v2074_v37 = vmul.f32 %v1951_v52, %v5394_v61  ;;  %v3415_v52 = vld [vmem:[%s5150_s5 + $0xc8] sm:$0xff] }
 0x6ba   :  { %v2125_v13 = vpack.c.bf16 %v2074_v37, %v2073_v19 }
 0x6bb   :  { %2168 = vmatmul.bf16.gmra.mxu0 %v5384_v41  ;;  %v5397_v41 = vld [vmem:[#allocation38_spill] sm:$0xff] }
 0x6bc   :  { %1993 = vmatmul.bf16.gmra.mxu3 %v3411_v53 }
 0x6bf   :  { %v1954_v30 = vpop.f32.mrf.mxu3 }
 0x6c0   :  { %v2075_v49 = vmul.f32 %v1954_v30, %v5393_v63  ;;  %v5398_v30 = vld [vmem:[#allocation48_spill] sm:$0xff] }
 0x6c7   :  { %v1956_v28 = vpop.f32.mrf.mxu3 }
 0x6c8   :  { %v2076_v33 = vmul.f32 %v1956_v28, %v5392_v46 }
 0x6ca   :  { %v2126_v31 = vpack.c.bf16 %v2076_v33, %v2075_v49  ;;  %v5408_v33 = vld [vmem:[#allocation64_spill] sm:$0xff]  ;;  %v3420_v49 = vld [vmem:[%s5150_s5 + $0xf0] sm:$0xff] }
 0x6cb   :  { %2173 = vmatmul.bf16.gmra.mxu0 %v5385_v34 }
 0x6cc   :  { %1998 = vmatmul.bf16.gmra.mxu3 %v3412_v50  ;;  %v5399_v50 = vld [vmem:[#allocation39_spill] sm:$0xff] }
 0x6cf   :  { %v1959_v39 = vpop.f32.mrf.mxu3 }
 0x6d0   :  { %v2077_v0 = vmul.f32 %v1959_v39, %v5391_v22  ;;  %v5407_v22 = vld [vmem:[#allocation61_spill] sm:$0xff] }
 0x6d7   :  { %v1961_v51 = vpop.f32.mrf.mxu3 }
 0x6d8   :  { %v2078_v35 = vmul.f32 %v1961_v51, %v5389_v58  ;;  %v5400_v51 = vld [vmem:[#allocation40_spill] sm:$0xff] }
 0x6da   :  { %v2127_v9 = vpack.c.bf16 %v2078_v35, %v2077_v0  ;;  %v5406_v35 = vld [vmem:[#allocation44_spill] sm:$0xff]  ;;  %v3418_v0 = vld [vmem:[%s5150_s5 + $0xe0] sm:$0xff] }
 0x6db   :  { %2178 = vmatmul.bf16.gmra.mxu0 %v5386_v12 }
 0x6dc   :  { %2003 = vmatmul.bf16.gmra.mxu3 %v3413_v42  ;;  %v5401_v42 = vld [vmem:[#allocation49_spill] sm:$0xff] }
 0x6df   :  { %v1964_v47 = vpop.f32.mrf.mxu3 }
 0x6e0   :  { %v2079_v36 = vmul.f32 %v1964_v47, %v5387_v25 }
 0x6e7   :  { %v1966_v43 = vpop.f32.mrf.mxu3 }
 0x6e8   :  { %v2080_v29 = vmul.f32 %v1966_v43, %v5388_v4  ;;  %v5403_v43 = vld [vmem:[#allocation42_spill] sm:$0xff]  ;;  %v5404_v4 = vld [vmem:[#allocation59_spill] sm:$0xff] }
 0x6ea   :  { %v2128_v44 = vpack.c.bf16 %v2080_v29, %v2079_v36  ;;  %v5405_v29 = vld [vmem:[#allocation43_spill] sm:$0xff] }
 0x6eb   :  { %2183 = vmatmul.bf16.gmra.mxu0 %v5390_v7 }
 0x6ec   :  { %2008 = vmatmul.bf16.gmra.mxu3 %v3414_v1  ;;  %2194 = vmatpush.bf16.msra.mxu0 %v2128_v44 }
 0x6ef   :  { %v1969_v18 = vpop.f32.mrf.mxu3 }
 0x6f0   :  { %2195 = vmatpush.bf16.msra.mxu0 %v2127_v9  ;;  %v4685_v60 = vmul.f32 %v1969_v18, %v5396_v5  ;;  %v3419_v9 = vld [vmem:[%s5150_s5 + $0xe8] sm:$0xff] }
 0x6f4   :  { %2196 = vmatpush.bf16.msra.mxu0 %v2126_v31  ;;  %v3421_v31 = vld [vmem:[%s5150_s5 + $0xf8] sm:$0xff] }
 0x6f7   :  { %v1971_v20 = vpop.f32.mrf.mxu3 }
 0x6f8   :  { %v4688_v53 = vmul.f32 %v1971_v20, %v5397_v41  ;;  %2197 = vmatpush.bf16.msra.mxu0 %v2125_v13  ;;  %v5409_v20 = vld [vmem:[#allocation50_spill] sm:$0xff]  ;;  %v5410_v41 = vld [vmem:[#allocation52_spill] sm:$0xff] }
 0x6fa   :  { %v2129_v28 = vpack.c.bf16 %v4688_v53, %v4685_v60  ;;  %v5428_v53 = vld [vmem:[#allocation73_spill] sm:$0xff] }
 0x6fb   :  { %2188 = vmatmul.bf16.gmra.mxu0 %v5398_v30 }
 0x6fc   :  { %2013 = vmatmul.bf16.gmra.mxu3 %v3415_v52  ;;  %2198 = vmatpush.bf16.msra.mxu0 %v2124_v10  ;;  %v5411_v52 = vld [vmem:[#allocation51_spill] sm:$0xff] }
 0x6ff   :  { %v1974_v62 = vpop.f32.mrf.mxu3 }
 0x700   :  { %2199 = vmatpush.bf16.msra.mxu0 %v2123_v6  ;;  %v4700_v39 = vmul.f32 %v1974_v62, %v5399_v50  ;;  %v5402_v6 = vld [vmem:[#allocation41_spill] sm:$0xff] }
 0x704   :  { %2200 = vmatpush.bf16.msra.mxu0 %v2122_v40 }
 0x707   :  { %v1976_v34 = vpop.f32.mrf.mxu3 }
 0x708   :  { %v4703_v12 = vmul.f32 %v1976_v34, %v5400_v51  ;;  %2201 = vmatpush.bf16.msra.mxu0 %v2121_v26  ;;  %v4736_v19 = vpop.f32.mrf.mxu0  ;;  %v5412_v51 = vld [vmem:[#allocation67_spill] sm:$0xff] }
 0x70a   :  { %v2130_v10 = vpack.c.bf16 %v4703_v12, %v4700_v39  ;;  %v5425_v12 = vld [vmem:[#allocation88_spill] sm:$0xff] }
 0x70b   :  { %2202 = vmatmul.bf16.vlgmr.msra.gmra.mxu0 %v5401_v42  ;;  %v5413_v42 = vld [vmem:[#allocation53_spill] sm:$0xff] }
 0x70c   :  { %2018 = vmatmul.bf16.gmra.mxu3 %v3416_v55 }
 0x70f   :  { %v1979_v17 = vpop.f32.mrf.mxu3 }
 0x710   :  { %v2085_v47 = vmul.f32 %v1979_v17, %v5402_v6  ;;  %v4741_v50 = vpop.f32.mrf.mxu0  ;;  %v5414_v17 = vld [vmem:[#allocation54_spill] sm:$0xff] }
 0x717   :  { %v1981_v40 = vpop.f32.mrf.mxu3 }
 0x718   :  { %v2086_v25 = vmul.f32 %v1981_v40, %v5403_v43  ;;  %v5415_v43 = vld [vmem:[#allocation55_spill] sm:$0xff] }
 0x71a   :  { %v2131_v36 = vpack.c.bf16 %v2086_v25, %v2085_v47 }
 0x71b   :  { %2207 = vmatmul.bf16.gmra.mxu0 %v5404_v4  ;;  %v5416_v4 = vld [vmem:[#allocation57_spill] sm:$0xff] }
 0x71c   :  { %2023 = vmatmul.bf16.gmra.mxu3 %v3417_v32 }
 0x71f   :  { %v1984_v15 = vpop.f32.mrf.mxu3 }
 0x720   :  { %v2087_v58 = vmul.f32 %v1984_v15, %v5405_v29  ;;  %v5417_v29 = vld [vmem:[#allocation58_spill] sm:$0xff] }
 0x727   :  { %v1986_v26 = vpop.f32.mrf.mxu3 }
 0x728   :  { %v2088_v44 = vmul.f32 %v1986_v26, %v5406_v35  ;;  %v4748_v26 = vpop.f32.mrf.mxu0 }
 0x72a   :  { %v2132_v7 = vpack.c.bf16 %v2088_v44, %v2087_v58 }
 0x72b   :  { %2212 = vmatmul.bf16.gmra.mxu0 %v5407_v22  ;;  %v5418_v22 = vld [vmem:[#allocation92_spill] sm:$0xff] }
 0x72c   :  { %2028 = vmatmul.bf16.gmra.mxu3 %v3418_v0 }
 0x72f   :  { %v1989_v1 = vpop.f32.mrf.mxu3 }
 0x730   :  { %v2089_v58 = vmul.f32 %v1989_v1, %v5417_v29 }
 0x737   :  { %v1991_v46 = vpop.f32.mrf.mxu3 }
 0x738   :  { %v2090_v32 = vmul.f32 %v1991_v46, %v5416_v4  ;;  %v5420_v46 = vld [vmem:[#allocation69_spill] sm:$0xff] }
 0x73a   :  { %v2133_v35 = vpack.c.bf16 %v2090_v32, %v2089_v58  ;;  %v5432_v32 = vld [vmem:[#allocation70_spill] sm:$0xff]  ;;  %v5433_v58 = vld [vmem:[#allocation72_spill] sm:$0xff] }
 0x73b   :  { %2217 = vmatmul.bf16.gmra.mxu0 %v5408_v33  ;;  %v5419_v33 = vld [vmem:[#allocation91_spill] sm:$0xff] }
 0x73c   :  { %2033 = vmatmul.bf16.gmra.mxu3 %v3419_v9 }
 0x73f   :  { %v1994_v18 = vpop.f32.mrf.mxu3 }
 0x740   :  { %v2091_v25 = vmul.f32 %v1994_v18, %v5415_v43  ;;  %v5431_v43 = vld [vmem:[#allocation68_spill] sm:$0xff] }
 0x747   :  { %v1996_v63 = vpop.f32.mrf.mxu3 }
 0x748   :  { %v2092_v40 = vmul.f32 %v1996_v63, %v5414_v17  ;;  %v4759_v63 = vpop.f32.mrf.mxu0 }
 0x74a   :  { %v2134_v15 = vpack.c.bf16 %v2092_v40, %v2091_v25  ;;  %v5430_v40 = vld [vmem:[#allocation84_spill] sm:$0xff] }
 0x74b   :  { %2222 = vmatmul.bf16.gmra.mxu0 %v5412_v51  ;;  %v5427_v51 = vld [vmem:[#allocation65_spill] sm:$0xff] }
 0x74c   :  { %2038 = vmatmul.bf16.gmra.mxu3 %v3420_v49 }
 0x74f   :  { %v1999_v61 = vpop.f32.mrf.mxu3 }
 0x750   :  { %v2093_v55 = vmul.f32 %v1999_v61, %v5413_v42  ;;  %v4762_v1 = vpop.f32.mrf.mxu0 }
 0x757   :  { %v2001_v37 = vpop.f32.mrf.mxu3 }
 0x758   :  { %v2094_v62 = vmul.f32 %v2001_v37, %v5411_v52  ;;  %v5421_v37 = vld [vmem:[#allocation90_spill] sm:$0xff] }
 0x759   :  { %v5426_v52 = vld [vmem:[#allocation86_spill] sm:$0xff] }
 0x75a   :  { %v2135_v6 = vpack.c.bf16 %v2094_v62, %v2093_v55  ;;  %v5429_v55 = vld [vmem:[#allocation85_spill] sm:$0xff] }
 0x75b   :  { %2227 = vmatmul.bf16.gmra.mxu0 %v5420_v46 }
 0x75c   :  { %2043 = vmatmul.bf16.gmra.mxu3 %v3421_v31 }
 0x75f   :  { %v2004_v8 = vpop.f32.mrf.mxu3 }
 0x760   :  { %v2095_v5 = vmul.f32 %v2004_v8, %v5409_v20  ;;  %v5422_v8 = vld [vmem:[#allocation89_spill] sm:$0xff] }
 0x767   :  { %v2006_v13 = vpop.f32.mrf.mxu3 }
 0x768   :  { %v2096_v30 = vmul.f32 %v2006_v13, %v5410_v41 }
 0x76a   :  { %v2136_v34 = vpack.c.bf16 %v2096_v30, %v2095_v5  ;;  %v5423_v5 = vld [vmem:[#allocation62_spill] sm:$0xff] }
 0x76c   :  { %2243 = vmatpush.bf16.msrb.mxu1 %v2136_v34 }
 0x76f   :  { %v2009_v47 = vpop.f32.mrf.mxu3 }
 0x770   :  { %2244 = vmatpush.bf16.msrb.mxu1 %v2135_v6  ;;  %v4752_v0 = vmul.f32 %v2009_v47, %v5418_v22  ;;  %v5434_v22 = vld [vmem:[#allocation74_spill] sm:$0xff] }
 0x774   :  { %2245 = vmatpush.bf16.msrb.mxu1 %v2134_v15 }
 0x777   :  { %v2011_v44 = vpop.f32.mrf.mxu3 }
 0x778   :  { %v4755_v9 = vmul.f32 %v2011_v44, %v5419_v33  ;;  %2246 = vmatpush.bf16.msrb.mxu1 %v2133_v35 }
 0x77a   :  { %v2137_v18 = vpack.c.bf16 %v4755_v9, %v4752_v0  ;;  %v5435_v9 = vld [vmem:[#allocation75_spill] sm:$0xff] }
 0x77c   :  { %2247 = vmatpush.bf16.msrb.mxu1 %v2132_v7  ;;  %v4773_v7 = vpop.f32.mrf.mxu0 }
 0x77f   :  { %v2014_v49 = vpop.f32.mrf.mxu3 }
 0x780   :  { %2248 = vmatpush.bf16.msrb.mxu1 %v2131_v36  ;;  %v2099_v31 = vmul.f32 %v2014_v49, %v5421_v37  ;;  %v5424_v36 = vld [vmem:[#allocation71_spill] sm:$0xff]  ;;  %v5436_v49 = vld [vmem:[#allocation77_spill] sm:$0xff]  ;;  %v5437_v37 = vld [vmem:[#allocation76_spill] sm:$0xff] }
 0x781   :  { %2232 = vmatmul.bf16.gmra.mxu0 %v5424_v36 }
 0x784   :  { %2249 = vmatpush.bf16.msrb.mxu1 %v2130_v10  ;;  %v4776_v30 = vpop.f32.mrf.mxu0 }
 0x787   :  { %v2016_v61 = vpop.f32.mrf.mxu3 }
 0x788   :  { %v2100_v13 = vmul.f32 %v2016_v61, %v5422_v8  ;;  %2250 = vmatpush.bf16.msrb.mxu1 %v2129_v28 }
 0x78a   :  { %v2138_v20 = vpack.c.bf16 %v2100_v13, %v2099_v31  ;;  %v5438_v13 = vld [vmem:[#allocation78_spill] sm:$0xff] }
 0x78b   :  { %2251 = vmatmul.bf16.vlgmr.msrb.gmra.mxu1 %v5423_v5  ;;  %v5439_v5 = vld [vmem:[#allocation79_spill] sm:$0xff] }
 0x78c   :  { %v4781_v60 = vpop.f32.mrf.mxu0 }
 0x78f   :  { %v2019_v41 = vpop.f32.mrf.mxu3 }
 0x790   :  { %v2101_v10 = vmul.f32 %v2019_v41, %v5425_v12  ;;  %v5440_v41 = vld [vmem:[#allocation80_spill] sm:$0xff] }
 0x791   :  { %2237 = vmatmul.bf16.gmra.mxu0 %v5428_v53 }
 0x797   :  { %v2021_v39 = vpop.f32.mrf.mxu3 }
 0x798   :  { %v2102_v62 = vmul.f32 %v2021_v39, %v5426_v52 }
 0x79a   :  { %v2139_v34 = vpack.c.bf16 %v2102_v62, %v2101_v10  ;;  %v5441_v10 = vld [vmem:[#allocation81_spill] sm:$0xff]  ;;  %v5442_v62 = vld [vmem:[#allocation82_spill] sm:$0xff] }
 0x79b   :  { %2256 = vmatmul.bf16.gmra.mxu1 %v5427_v51 }
 0x79f   :  { %v2024_v28 = vpop.f32.mrf.mxu3 }
 0x7a0   :  { %v2103_v17 = vmul.f32 %v2024_v28, %v5429_v55  ;;  %v5443_v28 = vld [vmem:[#allocation83_spill] sm:$0xff] }
 0x7a7   :  { %v2026_v42 = vpop.f32.mrf.mxu3 }
 0x7a8   :  { %v2104_v6 = vmul.f32 %v2026_v42, %v5430_v40  ;;  %v5445_v40 = vld [vmem:[#allocation93_spill] sm:$0xff] }
 0x7aa   :  { %v2140_v47 = vpack.c.bf16 %v2104_v6, %v2103_v17  ;;  %v5444_v17 = vld [vmem:[#allocation87_spill] sm:$0xff]  ;;  %v4801_v6 = vpop.f32.mrf.mxu0 }
 0x7ab   :  { %2261 = vmatmul.bf16.gmra.mxu1 %v5431_v43  ;;  %v5446_v43 = vld [vmem:[#allocation94_spill] sm:$0xff] }
 0x7af   :  { %v2029_v25 = vpop.f32.mrf.mxu3 }
 0x7b0   :  { %v2105_v42 = vmul.f32 %v2029_v25, %v5443_v28 }
 0x7b7   :  { %v2031_v4 = vpop.f32.mrf.mxu3 }
 0x7b8   :  { %v2106_v51 = vmul.f32 %v2031_v4, %v5442_v62  ;;  %v5447_v4 = vld [vmem:[#allocation95_spill] sm:$0xff]  ;;  %v266_v62 = vld [vmem:[%s5155_s10 + $0x8] sm:$0xff] }
 0x7ba   :  { %v2141_v55 = vpack.c.bf16 %v2106_v51, %v2105_v42  ;;  %v265_v51 = vld [vmem:[%s5155_s10] sm:$0xff] }
 0x7bb   :  { %2266 = vmatmul.bf16.gmra.mxu1 %v5432_v32  ;;  %v4804_v32 = vpop.f32.mrf.mxu0 }
 0x7bf   :  { %v2034_v15 = vpop.f32.mrf.mxu3 }
 0x7c0   :  { %v2107_v52 = vmul.f32 %v2034_v15, %v5441_v10 }
 0x7c3   :  { %v4807_v25 = vpop.f32.mrf.mxu0 }
 0x7c7   :  { %v2036_v29 = vpop.f32.mrf.mxu3 }
 0x7c8   :  { %v2108_v39 = vmul.f32 %v2036_v29, %v5440_v41  ;;  %v5448_v29 = vld [vmem:[#allocation96_spill] sm:$0xff]  ;;  %v269_v41 = vld [vmem:[%s5155_s10 + $0x20] sm:$0xff] }
 0x7ca   :  { %v2142_v53 = vpack.c.bf16 %v2108_v39, %v2107_v52  ;;  %v268_v39 = vld [vmem:[%s5155_s10 + $0x18] sm:$0xff] }
 0x7cb   :  { %2271 = vmatmul.bf16.gmra.mxu1 %v5433_v58  ;;  %v4809_v15 = vpop.f32.mrf.mxu0  ;;  %v5450_v58 = vld [vmem:[#allocation98_spill] sm:$0xff] }
 0x7cf   :  { %v2039_v35 = vpop.f32.mrf.mxu3 }
 0x7d0   :  { %v2109_v36 = vmul.f32 %v2039_v35, %v5439_v5  ;;  %v280_v35 = vld [vmem:[%s5155_s10 + $0x78] sm:$0xff] }
 0x7d1   :  { %2376 = vmatpush.msrb.mxu0 %v280_v35 }
 0x7d7   :  { %v2041_v44 = vpop.f32.mrf.mxu3 }
 0x7d8   :  { %v2110_v31 = vmul.f32 %v2041_v44, %v5437_v37  ;;  %v279_v44 = vld [vmem:[%s5155_s10 + $0x70] sm:$0xff]  ;;  %v272_v37 = vld [vmem:[%s5155_s10 + $0x38] sm:$0xff] }
 0x7d9   :  { %2377 = vmatpush.msrb.mxu0 %v279_v44 }
 0x7da   :  { %v2143_v12 = vpack.c.bf16 %v2110_v31, %v2109_v36  ;;  %v270_v36 = vld [vmem:[%s5155_s10 + $0x28] sm:$0xff] }
 0x7db   :  { %2276 = vmatmul.bf16.gmra.mxu1 %v5434_v22  ;;  %v278_v22 = vld [vmem:[%s5155_s10 + $0x68] sm:$0xff] }
 0x7dc   :  { %2378 = vmatpush.msrb.mxu0 %v278_v22 }
 0x7df   :  { %v2044_v0 = vpop.f32.mrf.mxu3 }
 0x7e0   :  { %v2111_v46 = vmul.f32 %v2044_v0, %v5435_v9  ;;  %v277_v0 = vld [vmem:[%s5155_s10 + $0x60] sm:$0xff]  ;;  %v276_v9 = vld [vmem:[%s5155_s10 + $0x58] sm:$0xff] }
 0x7e1   :  { %2379 = vmatpush.msrb.mxu0 %v277_v0 }
 0x7e3   :  { %2380 = vmatpush.msrb.mxu0 %v276_v9 }
 0x7e7   :  { %v2046_v33 = vpop.f32.mrf.mxu3 }
 0x7e8   :  { %v2112_v61 = vmul.f32 %v2046_v33, %v5436_v49  ;;  %v274_v49 = vld [vmem:[%s5155_s10 + $0x48] sm:$0xff] }
 0x7ea   :  { %v2144_v8 = vpack.c.bf16 %v2112_v61, %v2111_v46  ;;  %v275_v46 = vld [vmem:[%s5155_s10 + $0x50] sm:$0xff]  ;;  %v273_v61 = vld [vmem:[%s5155_s10 + $0x40] sm:$0xff] }
 0x7eb   :  { %2281 = vmatmul.bf16.gmra.mxu1 %v5438_v13  ;;  %2381 = vmatpush.msrb.mxu0 %v275_v46  ;;  %v271_v13 = vld [vmem:[%s5155_s10 + $0x30] sm:$0xff] }
 0x7ec   :  { %2292 = vmatpush.bf16.msrb.mxu2 %v2144_v8  ;;  %v5451_v8 = vld [vmem:[#allocation99_spill] sm:$0xff] }
 0x7ed   :  { %2382 = vmatpush.msrb.mxu0 %v274_v49 }
 0x7ef   :  { %2383 = vmatpush.msrb.mxu0 %v273_v61 }
 0x7f0   :  { %2293 = vmatpush.bf16.msrb.mxu2 %v2143_v12  ;;  %v267_v12 = vld [vmem:[%s5155_s10 + $0x10] sm:$0xff] }
 0x7f1   :  { %2384 = vmatpush.msrb.mxu0 %v272_v37 }
 0x7f3   :  { %2385 = vmatpush.msrb.mxu0 %v271_v13 }
 0x7f4   :  { %2294 = vmatpush.bf16.msrb.mxu2 %v2142_v53  ;;  %v5452_v53 = vld [vmem:[#allocation100_spill] sm:$0xff] }
 0x7f5   :  { %2386 = vmatpush.msrb.mxu0 %v270_v36 }
 0x7f7   :  { %2387 = vmatpush.msrb.mxu0 %v269_v41 }
 0x7f8   :  { %2295 = vmatpush.bf16.msrb.mxu2 %v2141_v55 }
 0x7f9   :  { %2388 = vmatpush.msrb.mxu0 %v268_v39 }
 0x7fb   :  { %2286 = vmatmul.bf16.gmra.mxu1 %v5444_v17  ;;  %2389 = vmatpush.msrb.mxu0 %v267_v12 }
 0x7fc   :  { %2296 = vmatpush.bf16.msrb.mxu2 %v2140_v47  ;;  %v4812_v47 = vpop.f32.mrf.mxu0 }
 0x7fd   :  { %2390 = vmatpush.msrb.mxu0 %v266_v62 }
 0x7ff   :  { %2391 = vmatpush.msrb.mxu0 %v265_v51 }
 0x800   :  { %2297 = vmatpush.bf16.msrb.mxu2 %v2139_v34 }
 0x804   :  { %2298 = vmatpush.bf16.msrb.mxu2 %v2138_v20  ;;  %v5449_v20 = vld [vmem:[#allocation97_spill] sm:$0xff] }
 0x808   :  { %2299 = vmatpush.bf16.msrb.mxu2 %v2137_v18  ;;  %v4815_v18 = vpop.f32.mrf.mxu0  ;;  %v2252_v5 = vpop.f32.mrf.mxu1 }
 0x80b   :  { %2300 = vmatmul.bf16.vlgmr.msrb.gmra.mxu2 %v5445_v40 }
 0x810   :  { %v4817_v34 = vpop.f32.mrf.mxu0  ;;  %v2254_v52 = vpop.f32.mrf.mxu1 }
 0x818   :  { %v4832_v33 = vpop.f32.mrf.mxu0  ;;  %v2257_v42 = vpop.f32.mrf.mxu1 }
 0x81b   :  { %2305 = vmatmul.bf16.gmra.mxu2 %v5446_v43 }
 0x820   :  { %v2203_v31 = vpop.f32.mrf.mxu0  ;;  %v2259_v40 = vpop.f32.mrf.mxu1 }
 0x821   :  { %v2204_v17 = vadd.f32 %v2203_v31, %v4736_v19 }
 0x823   :  { %v2253_v43 = vadd.f32 %v2252_v5, %v2204_v17 }
 0x828   :  { %v2205_v10 = vpop.f32.mrf.mxu0  ;;  %v2262_v44 = vpop.f32.mrf.mxu1 }
 0x829   :  { %v2206_v35 = vadd.f32 %v2205_v10, %v4741_v50 }
 0x82b   :  { %2310 = vmatmul.bf16.gmra.mxu2 %v5447_v4  ;;  %v2255_v22 = vadd.f32 %v2254_v52, %v2206_v35 }
 0x830   :  { %v2208_v28 = vpop.f32.mrf.mxu0 }
 0x831   :  { %v2209_v61 = vadd.f32 %v2208_v28, %v4748_v26 }
 0x833   :  { %v2258_v37 = vadd.f32 %v2257_v42, %v2209_v61 }
 0x838   :  { %v2210_v55 = vpop.f32.mrf.mxu0 }
 0x839   :  { %v2211_v50 = vadd.f32 %v2210_v55, %v4759_v63 }
 0x83b   :  { %2315 = vmatmul.bf16.gmra.mxu2 %v5448_v29  ;;  %v2260_v36 = vadd.f32 %v2259_v40, %v2211_v50 }
 0x84b   :  { %2320 = vmatmul.bf16.gmra.mxu2 %v5449_v20 }
 0x85b   :  { %2325 = vmatmul.bf16.gmra.mxu2 %v5450_v58  ;;  %v2213_v58 = vpop.f32.mrf.mxu0 }
 0x85c   :  { %v2214_v52 = vadd.f32 %v2213_v58, %v4762_v1 }
 0x85e   :  { %v2263_v62 = vadd.f32 %v2262_v44, %v2214_v52 }
 0x863   :  { %v2215_v19 = vpop.f32.mrf.mxu0 }
 0x864   :  { %v2216_v55 = vadd.f32 %v2215_v19, %v4773_v7 }
 0x86b   :  { %2330 = vmatmul.bf16.gmra.mxu2 %v5451_v8  ;;  %v2264_v8 = vpop.f32.mrf.mxu1  ;;  %v2218_v39 = vpop.f32.mrf.mxu0 }
 0x86c   :  { %v2265_v17 = vadd.f32 %v2264_v8, %v2216_v55 }
 0x873   :  { %v2267_v12 = vpop.f32.mrf.mxu1 }
 0x87b   :  { %2335 = vmatmul.bf16.gmra.mxu2 %v5452_v53  ;;  %v2269_v63 = vpop.f32.mrf.mxu1 }
 0x88e   :  { %v2301_v4 = vpop.f32.mrf.mxu2 }
 0x88f   :  { %v2302_v29 = vadd.f32 %v2301_v4, %v2253_v43  ;;  %v2219_v4 = vadd.f32 %v2218_v39, %v4776_v30 }
 0x891   :  { %v2341_v20 = vmul.f32 %v2302_v29, %v4544_v11  ;;  %v2268_v58 = vadd.f32 %v2267_v12, %v2219_v4 }
 0x893   :  { %3293 = vtanh.f32 %v2341_v20  ;;  %v2272_v20 = vpop.f32.mrf.mxu1 }
 0x896   :  { %v2303_v0 = vpop.f32.mrf.mxu2 }
 0x897   :  { %v2304_v9 = vadd.f32 %v2303_v0, %v2255_v22 }
 0x899   :  { %v3294_v46 = vpop.eup %3293  ;;  %v2342_v49 = vmul.f32 %v2304_v9, %v4540_v56 }
 0x89a   :  { %2392 = vmatmul.f32.vlgmr.msrb.gmra.mxu0 %v3294_v46 }
 0x89b   :  { %3295 = vtanh.f32 %v2342_v49 }
 0x89e   :  { %v2306_v31 = vpop.f32.mrf.mxu2 }
 0x89f   :  { %v2307_v11 = vadd.f32 %v2306_v31, %v2258_v37 }
 0x8a1   :  { %v3296_v13 = vpop.eup %3295  ;;  %v2343_v5 = vmul.f32 %v2307_v11, %v4518_v59  ;;  %v2220_v59 = vpop.f32.mrf.mxu0 }
 0x8a2   :  { %2395 = vmatmul.f32.gmra.mxu0 %v3296_v13  ;;  %v2221_v7 = vadd.f32 %v2220_v59, %v4781_v60 }
 0x8a3   :  { %3297 = vtanh.f32 %v2343_v5 }
 0x8a4   :  { %v2270_v9 = vadd.f32 %v2269_v63, %v2221_v7 }
 0x8a6   :  { %v2308_v41 = vpop.f32.mrf.mxu2 }
 0x8a7   :  { %v2309_v56 = vadd.f32 %v2308_v41, %v2260_v36 }
 0x8a9   :  { %v3298_v26 = vpop.eup %3297  ;;  %v2344_v10 = vmul.f32 %v2309_v56, %v4533_v38  ;;  %v2223_v29 = vpop.f32.mrf.mxu0 }
 0x8aa   :  { %2398 = vmatmul.f32.gmra.mxu0 %v3298_v26  ;;  %v2224_v19 = vadd.f32 %v2223_v29, %v4801_v6 }
 0x8ab   :  { %3299 = vtanh.f32 %v2344_v10 }
 0x8ac   :  { %v2273_v37 = vadd.f32 %v2272_v20, %v2224_v19  ;;  %v4907_v19 = vld [vmem:[%s5156_s11] ss:$0 sm:$0xff] }
 0x8ae   :  { %v2311_v51 = vpop.f32.mrf.mxu2 }
 0x8af   :  { %v2312_v53 = vadd.f32 %v2311_v51, %v2263_v62 }
 0x8b1   :  { %v3300_v28 = vpop.eup %3299  ;;  %v2345_v42 = vmul.f32 %v2312_v53, %v4509_v3  ;;  %v2225_v0 = vpop.f32.mrf.mxu0 }
 0x8b2   :  { %2401 = vmatmul.f32.gmra.mxu0 %v3300_v28  ;;  %v2226_v5 = vadd.f32 %v2225_v0, %v4804_v32 }
 0x8b3   :  { %3301 = vtanh.f32 %v2345_v42 }
 0x8b6   :  { %v2313_v40 = vpop.f32.mrf.mxu2 }
 0x8b7   :  { %v2314_v43 = vadd.f32 %v2313_v40, %v2265_v17 }
 0x8b9   :  { %v3302_v38 = vpop.eup %3301  ;;  %v2346_v1 = vmul.f32 %v2314_v43, %v4524_v14  ;;  %v2274_v14 = vpop.f32.mrf.mxu1 }
 0x8ba   :  { %2404 = vmatmul.f32.gmra.mxu0 %v3302_v38  ;;  %v2228_v8 = vpop.f32.mrf.mxu0  ;;  %v2275_v50 = vadd.f32 %v2274_v14, %v2226_v5 }
 0x8bb   :  { %3303 = vtanh.f32 %v2346_v1  ;;  %v2229_v56 = vadd.f32 %v2228_v8, %v4807_v25 }
 0x8be   :  { %v2316_v35 = vpop.f32.mrf.mxu2 }
 0x8bf   :  { %v2317_v3 = vadd.f32 %v2316_v35, %v2268_v58 }
 0x8c1   :  { %v3304_v44 = vpop.eup %3303  ;;  %v2347_v22 = vmul.f32 %v2317_v3, %v4503_v24  ;;  %v2277_v11 = vpop.f32.mrf.mxu1 }
 0x8c2   :  { %2407 = vmatmul.f32.gmra.mxu0 %v3304_v44  ;;  %v2278_v26 = vadd.f32 %v2277_v11, %v2229_v56 }
 0x8c3   :  { %3305 = vtanh.f32 %v2347_v22 }
 0x8c6   :  { %v2318_v46 = vpop.f32.mrf.mxu2 }
 0x8c7   :  { %v2319_v49 = vadd.f32 %v2318_v46, %v2270_v9 }
 0x8c9   :  { %v3306_v30 = vpop.eup %3305  ;;  %v2348_v61 = vmul.f32 %v2319_v49, %v4500_v57  ;;  %v2230_v57 = vpop.f32.mrf.mxu0 }
 0x8ca   :  { %2410 = vmatmul.f32.gmra.mxu0 %v3306_v30  ;;  %v2279_v12 = vpop.f32.mrf.mxu1  ;;  %v2231_v51 = vadd.f32 %v2230_v57, %v4809_v15 }
 0x8cb   :  { %3307 = vtanh.f32 %v2348_v61 }
 0x8cc   :  { %v2280_v59 = vadd.f32 %v2279_v12, %v2231_v51 }
 0x8ce   :  { %v2321_v31 = vpop.f32.mrf.mxu2 }
 0x8cf   :  { %v2322_v24 = vadd.f32 %v2321_v31, %v2273_v37 }
 0x8d1   :  { %v3308_v13 = vpop.eup %3307  ;;  %v2349_v60 = vmul.f32 %v2322_v24, %v4483_v27  ;;  %v2233_v32 = vpop.f32.mrf.mxu0 }
 0x8d2   :  { %2413 = vmatmul.f32.gmra.mxu0 %v3308_v13  ;;  %v2282_v53 = vpop.f32.mrf.mxu1  ;;  %v2234_v63 = vadd.f32 %v2233_v32, %v4812_v47 }
 0x8d3   :  { %3309 = vtanh.f32 %v2349_v60 }
 0x8d4   :  { %v2283_v17 = vadd.f32 %v2282_v53, %v2234_v63 }
 0x8d6   :  { %v2323_v36 = vpop.f32.mrf.mxu2 }
 0x8d7   :  { %v2324_v41 = vadd.f32 %v2323_v36, %v2275_v50 }
 0x8d9   :  { %v3310_v39 = vpop.eup %3309  ;;  %v2350_v6 = vmul.f32 %v2324_v41, %v4491_v54  ;;  %v2235_v55 = vpop.f32.mrf.mxu0 }
 0x8da   :  { %2416 = vmatmul.f32.gmra.mxu0 %v3310_v39  ;;  %v2236_v15 = vadd.f32 %v2235_v55, %v4815_v18 }
 0x8db   :  { %3311 = vtanh.f32 %v2350_v6 }
 0x8de   :  { %v2326_v10 = vpop.f32.mrf.mxu2 }
 0x8df   :  { %v2327_v52 = vadd.f32 %v2326_v10, %v2278_v26 }
 0x8e1   :  { %v3312_v27 = vpop.eup %3311  ;;  %v2351_v62 = vmul.f32 %v2327_v52, %v4478_v45  ;;  %v2284_v45 = vpop.f32.mrf.mxu1 }
 0x8e2   :  { %2419 = vmatmul.f32.gmra.mxu0 %v3312_v27  ;;  %v2285_v4 = vadd.f32 %v2284_v45, %v2236_v15  ;;  %v2238_v20 = vpop.f32.mrf.mxu0 }
 0x8e3   :  { %3313 = vtanh.f32 %v2351_v62  ;;  %v2239_v3 = vadd.f32 %v2238_v20, %v4817_v34 }
 0x8e6   :  { %v2328_v28 = vpop.f32.mrf.mxu2 }
 0x8e7   :  { %v2329_v54 = vadd.f32 %v2328_v28, %v2280_v59 }
 0x8e9   :  { %v3314_v42 = vpop.eup %3313  ;;  %v2352_v25 = vmul.f32 %v2329_v54, %v4486_v21  ;;  %v2287_v58 = vpop.f32.mrf.mxu1 }
 0x8ea   :  { %2422 = vmatmul.f32.gmra.mxu0 %v3314_v42  ;;  %v2288_v44 = vadd.f32 %v2287_v58, %v2239_v3 }
 0x8eb   :  { %3315 = vtanh.f32 %v2352_v25 }
 0x8ee   :  { %v2331_v40 = vpop.f32.mrf.mxu2 }
 0x8ef   :  { %v2332_v43 = vadd.f32 %v2331_v40, %v2283_v17 }
 0x8f1   :  { %v3316_v38 = vpop.eup %3315  ;;  %v2353_v1 = vmul.f32 %v2332_v43, %v4474_v48  ;;  %v2240_v48 = vpop.f32.mrf.mxu0 }
 0x8f2   :  { %2425 = vmatmul.f32.gmra.mxu0 %v3316_v38  ;;  %v2289_v18 = vpop.f32.mrf.mxu1  ;;  %v2241_v46 = vadd.f32 %v2240_v48, %v4832_v33 }
 0x8f3   :  { %3317 = vtanh.f32 %v2353_v1 }
 0x8f4   :  { %v2290_v14 = vadd.f32 %v2289_v18, %v2241_v46 }
 0x8f6   :  { %v2333_v29 = vpop.f32.mrf.mxu2 }
 0x8f7   :  { %v2334_v21 = vadd.f32 %v2333_v29, %v2285_v4 }
 0x8f9   :  { %v3318_v47 = vpop.eup %3317  ;;  %v2354_v35 = vmul.f32 %v2334_v21, %v4480_v2 }
 0x8fa   :  { %2428 = vmatmul.f32.gmra.mxu0 %v3318_v47 }
 0x8fb   :  { %3319 = vtanh.f32 %v2354_v35 }
 0x8fe   :  { %v2336_v22 = vpop.f32.mrf.mxu2 }
 0x8ff   :  { %v2337_v7 = vadd.f32 %v2336_v22, %v2288_v44 }
 0x901   :  { %v3320_v0 = vpop.eup %3319  ;;  %v2355_v9 = vmul.f32 %v2337_v7, %v4472_v23 }
 0x902   :  { %2431 = vmatmul.f32.gmra.mxu0 %v3320_v0 }
 0x903   :  { %3321 = vtanh.f32 %v2355_v9 }
 0x906   :  { %v2338_v49 = vpop.f32.mrf.mxu2 }
 0x907   :  { %v2339_v30 = vadd.f32 %v2338_v49, %v2290_v14 }
 0x909   :  { %v3322_v2 = vpop.eup %3321  ;;  %v2356_v34 = vmul.f32 %v2339_v30, %v4476_v16 }
 0x90a   :  { %2434 = vmatmul.f32.gmra.mxu0 %v3322_v2 }
 0x90b   :  { %3323 = vtanh.f32 %v2356_v34 }
 0x911   :  { %v3324_v61 = vpop.eup %3323 }
 0x912   :  { %2437 = vmatmul.f32.gmra.mxu0 %v3324_v61 }
 0x917   :  { %v2393_v23 = vpop.f32.mrf.mxu0 }
 0x918   :  { %v2394_v37 = vadd.f32 %v4907_v19, %v2393_v23 }
 0x91a   :  { %v2441_v33 = vsel %vm420_vm0, %v2394_v37, -inf }
 0x91b   :  { %2442 = vmax.xlane.f32.xlu1 %v2441_v33 }
 0x91f   :  { %v2396_v31 = vpop.f32.mrf.mxu0 }
 0x920   :  { %v4912_v8 = vadd.f32 %v4907_v19, %v2396_v31 }
 0x922   :  { %v2444_v16 = vsel %vm420_vm0, %v4912_v8, -inf }
 0x923   :  { %2445 = vmax.xlane.f32.xlu2 %v2444_v16 }
 0x927   :  { %v2399_v24 = vpop.f32.mrf.mxu0 }
 0x928   :  { %v4917_v11 = vadd.f32 %v4907_v19, %v2399_v24 }
 0x92a   :  { %v2447_v13 = vsel %vm420_vm0, %v4917_v11, -inf }
 0x92b   :  { %2448 = vmax.xlane.f32.xlu0 %v2447_v13 }
 0x92f   :  { %v2402_v60 = vpop.f32.mrf.mxu0 }
 0x930   :  { %v4922_v5 = vadd.f32 %v4907_v19, %v2402_v60 }
 0x932   :  { %v2450_v50 = vsel %vm420_vm0, %v4922_v5, -inf }
 0x933   :  { %2451 = vmax.xlane.f32.xlu2 %v2450_v50 }
 0x937   :  { %v2405_v36 = vpop.f32.mrf.mxu0 }
 0x938   :  { %v4927_v41 = vadd.f32 %v4907_v19, %v2405_v36 }
 0x93a   :  { %v2453_v57 = vsel %vm420_vm0, %v4927_v41, -inf }
 0x93b   :  { %2454 = vmax.xlane.f32.xlu1 %v2453_v57 }
 0x93f   :  { %v2408_v39 = vpop.f32.mrf.mxu0 }
 0x940   :  { %v4932_v6 = vadd.f32 %v4907_v19, %v2408_v39 }
 0x942   :  { %v2456_v56 = vsel %vm420_vm0, %v4932_v6, -inf }
 0x943   :  { %2457 = vmax.xlane.f32.xlu2 %v2456_v56 }
 0x947   :  { %v2411_v12 = vpop.f32.mrf.mxu0 }
 0x948   :  { %v4937_v26 = vadd.f32 %v4907_v19, %v2411_v12 }
 0x94a   :  { %v2459_v10 = vsel %vm420_vm0, %v4937_v26, -inf }
 0x94b   :  { %2460 = vmax.xlane.f32.xlu0 %v2459_v10 }
 0x94f   :  { %v2414_v52 = vpop.f32.mrf.mxu0 }
 0x950   :  { %v4942_v27 = vadd.f32 %v4907_v19, %v2414_v52 }
 0x952   :  { %v2462_v62 = vsel %vm420_vm0, %v4942_v27, -inf }
 0x953   :  { %2463 = vmax.xlane.f32.xlu1 %v2462_v62 }
 0x957   :  { %v2417_v32 = vpop.f32.mrf.mxu0 }
 0x958   :  { %v4947_v51 = vadd.f32 %v4907_v19, %v2417_v32 }
 0x95a   :  { %v2465_v53 = vsel %vm420_vm0, %v4947_v51, -inf }
 0x95b   :  { %2466 = vmax.xlane.f32.xlu2 %v2465_v53 }
 0x95f   :  { %v2420_v59 = vpop.f32.mrf.mxu0 }
 0x960   :  { %v4952_v28 = vadd.f32 %v4907_v19, %v2420_v59 }
 0x962   :  { %v2468_v54 = vsel %vm420_vm0, %v4952_v28, -inf }
 0x963   :  { %2469 = vmax.xlane.f32.xlu0 %v2468_v54 }
 0x967   :  { %v2423_v42 = vpop.f32.mrf.mxu0 }
 0x968   :  { %v4957_v25 = vadd.f32 %v4907_v19, %v2423_v42 }
 0x96a   :  { %v2471_v63 = vsel %vm420_vm0, %v4957_v25, -inf }
 0x96b   :  { %2472 = vmax.xlane.f32.xlu1 %v2471_v63 }
 0x96f   :  { %v2426_v55 = vpop.f32.mrf.mxu0 }
 0x970   :  { %v4962_v17 = vadd.f32 %v4907_v19, %v2426_v55 }
 0x972   :  { %v2474_v40 = vsel %vm420_vm0, %v4962_v17, -inf }
 0x973   :  { %2475 = vmax.xlane.f32.xlu2 %v2474_v40 }
 0x977   :  { %v2429_v45 = vpop.f32.mrf.mxu0 }
 0x978   :  { %v4967_v43 = vadd.f32 %v4907_v19, %v2429_v45 }
 0x97a   :  { %v2477_v38 = vsel %vm420_vm0, %v4967_v43, -inf }
 0x97b   :  { %2478 = vmax.xlane.f32.xlu0 %v2477_v38 }
 0x97f   :  { %v2432_v1 = vpop.f32.mrf.mxu0 }
 0x980   :  { %v4972_v15 = vadd.f32 %v4907_v19, %v2432_v1 }
 0x982   :  { %v2480_v4 = vsel %vm420_vm0, %v4972_v15, -inf }
 0x983   :  { %2481 = vmax.xlane.f32.xlu1 %v2480_v4 }
 0x987   :  { %v2435_v29 = vpop.f32.mrf.mxu0 }
 0x988   :  { %v4977_v20 = vadd.f32 %v4907_v19, %v2435_v29 }
 0x98a   :  { %v2483_v21 = vsel %vm420_vm0, %v4977_v20, -inf }
 0x98b   :  { %2484 = vmax.xlane.f32.xlu2 %v2483_v21 }
 0x98e   :  { %v2443_v58 = vpop.xlane.xlu1 %2442 }
 0x98f   :  { %v4981_v47 = vsub.f32 %v2394_v37, %v2443_v58  ;;  %v2438_v35 = vpop.f32.mrf.mxu0 }
 0x990   :  { %v4984_v3 = vadd.f32 %v4907_v19, %v2438_v35 }
 0x991   :  { %v2505_v44 = vmul.f32 1.442695, %v4981_v47 }
 0x992   :  { %v2486_v22 = vsel %vm420_vm0, %v4984_v3, -inf }
 0x993   :  { %3325 = vpow2.f32 %v2505_v44  ;;  %2487 = vmax.xlane.f32.xlu0 %v2486_v22 }
 0x996   :  { %v2446_v7 = vpop.xlane.xlu2 %2445 }
 0x997   :  { %v4990_v48 = vsub.f32 %v4912_v8, %v2446_v7 }
 0x999   :  { %v3326_v0 = vpop.eup %3325  ;;  %v2507_v9 = vmul.f32 1.442695, %v4990_v48 }
 0x99a   :  { %v2537_v18 = vsel %vm420_vm0, %v3326_v0, 0.0 }
 0x99b   :  { %3327 = vpow2.f32 %v2507_v9  ;;  %2538 = vadd.xlane.f32.xlu1 %v2537_v18 }
 0x99e   :  { %v2449_v46 = vpop.xlane.xlu0 %2448 }
 0x99f   :  { %v4995_v14 = vsub.f32 %v4917_v11, %v2449_v46 }
 0x9a1   :  { %v3328_v49 = vpop.eup %3327  ;;  %v2509_v30 = vmul.f32 1.442695, %v4995_v14 }
 0x9a2   :  { %v2540_v2 = vsel %vm420_vm0, %v3328_v49, 0.0 }
 0x9a3   :  { %3329 = vpow2.f32 %v2509_v30  ;;  %2541 = vadd.xlane.f32.xlu2 %v2540_v2 }
 0x9a6   :  { %v2452_v34 = vpop.xlane.xlu2 %2451 }
 0x9a7   :  { %v5000_v61 = vsub.f32 %v4922_v5, %v2452_v34 }
 0x9a9   :  { %v3330_v19 = vpop.eup %3329  ;;  %v2511_v23 = vmul.f32 1.442695, %v5000_v61 }
 0x9aa   :  { %v2543_v37 = vsel %vm420_vm0, %v3330_v19, 0.0 }
 0x9ab   :  { %3331 = vpow2.f32 %v2511_v23  ;;  %2544 = vadd.xlane.f32.xlu0 %v2543_v37 }
 0x9ae   :  { %v2455_v33 = vpop.xlane.xlu1 %2454 }
 0x9af   :  { %v5005_v31 = vsub.f32 %v4927_v41, %v2455_v33 }
 0x9b1   :  { %v3332_v8 = vpop.eup %3331  ;;  %v2513_v16 = vmul.f32 1.442695, %v5005_v31 }
 0x9b2   :  { %v2546_v24 = vsel %vm420_vm0, %v3332_v8, 0.0 }
 0x9b3   :  { %3333 = vpow2.f32 %v2513_v16  ;;  %2547 = vadd.xlane.f32.xlu1 %v2546_v24 }
 0x9b6   :  { %v2458_v11 = vpop.xlane.xlu2 %2457 }
 0x9b7   :  { %v5010_v13 = vsub.f32 %v4932_v6, %v2458_v11 }
 0x9b9   :  { %v3334_v60 = vpop.eup %3333  ;;  %v2515_v5 = vmul.f32 1.442695, %v5010_v13 }
 0x9ba   :  { %v2549_v50 = vsel %vm420_vm0, %v3334_v60, 0.0 }
 0x9bb   :  { %3335 = vpow2.f32 %v2515_v5  ;;  %2550 = vadd.xlane.f32.xlu2 %v2549_v50 }
 0x9be   :  { %v2461_v36 = vpop.xlane.xlu0 %2460 }
 0x9bf   :  { %v5015_v41 = vsub.f32 %v4937_v26, %v2461_v36 }
 0x9c1   :  { %v3336_v57 = vpop.eup %3335  ;;  %v2517_v39 = vmul.f32 1.442695, %v5015_v41 }
 0x9c2   :  { %v2552_v56 = vsel %vm420_vm0, %v3336_v57, 0.0 }
 0x9c3   :  { %3337 = vpow2.f32 %v2517_v39  ;;  %2553 = vadd.xlane.f32.xlu0 %v2552_v56 }
 0x9c6   :  { %v2464_v6 = vpop.xlane.xlu1 %2463 }
 0x9c7   :  { %v5020_v12 = vsub.f32 %v4942_v27, %v2464_v6 }
 0x9c9   :  { %v3338_v10 = vpop.eup %3337  ;;  %v2519_v52 = vmul.f32 1.442695, %v5020_v12 }
 0x9ca   :  { %v2555_v62 = vsel %vm420_vm0, %v3338_v10, 0.0 }
 0x9cb   :  { %3339 = vpow2.f32 %v2519_v52  ;;  %2556 = vadd.xlane.f32.xlu1 %v2555_v62 }
 0x9ce   :  { %v2467_v26 = vpop.xlane.xlu2 %2466 }
 0x9cf   :  { %v5025_v32 = vsub.f32 %v4947_v51, %v2467_v26 }
 0x9d1   :  { %v3340_v53 = vpop.eup %3339  ;;  %v2521_v59 = vmul.f32 1.442695, %v5025_v32 }
 0x9d2   :  { %v2558_v54 = vsel %vm420_vm0, %v3340_v53, 0.0 }
 0x9d3   :  { %3341 = vpow2.f32 %v2521_v59  ;;  %2559 = vadd.xlane.f32.xlu2 %v2558_v54 }
 0x9d6   :  { %v2470_v27 = vpop.xlane.xlu0 %2469 }
 0x9d7   :  { %v5030_v42 = vsub.f32 %v4952_v28, %v2470_v27 }
 0x9d9   :  { %v3342_v63 = vpop.eup %3341  ;;  %v2523_v55 = vmul.f32 1.442695, %v5030_v42 }
 0x9da   :  { %v2561_v40 = vsel %vm420_vm0, %v3342_v63, 0.0 }
 0x9db   :  { %3343 = vpow2.f32 %v2523_v55  ;;  %2562 = vadd.xlane.f32.xlu0 %v2561_v40 }
 0x9de   :  { %v2473_v51 = vpop.xlane.xlu1 %2472 }
 0x9df   :  { %v5035_v45 = vsub.f32 %v4957_v25, %v2473_v51 }
 0x9e1   :  { %v3344_v38 = vpop.eup %3343  ;;  %v2525_v1 = vmul.f32 1.442695, %v5035_v45 }
 0x9e2   :  { %v2564_v4 = vsel %vm420_vm0, %v3344_v38, 0.0 }
 0x9e3   :  { %3345 = vpow2.f32 %v2525_v1  ;;  %2565 = vadd.xlane.f32.xlu1 %v2564_v4 }
 0x9e6   :  { %v2476_v28 = vpop.xlane.xlu2 %2475 }
 0x9e7   :  { %v5040_v29 = vsub.f32 %v4962_v17, %v2476_v28 }
 0x9e9   :  { %v3346_v21 = vpop.eup %3345  ;;  %v2527_v58 = vmul.f32 1.442695, %v5040_v29 }
 0x9ea   :  { %v2567_v35 = vsel %vm420_vm0, %v3346_v21, 0.0 }
 0x9eb   :  { %3347 = vpow2.f32 %v2527_v58  ;;  %2568 = vadd.xlane.f32.xlu2 %v2567_v35 }
 0x9ee   :  { %v2479_v25 = vpop.xlane.xlu0 %2478 }
 0x9ef   :  { %v5045_v44 = vsub.f32 %v4967_v43, %v2479_v25 }
 0x9f1   :  { %v3348_v22 = vpop.eup %3347  ;;  %v2529_v7 = vmul.f32 1.442695, %v5045_v44 }
 0x9f2   :  { %v2570_v0 = vsel %vm420_vm0, %v3348_v22, 0.0 }
 0x9f3   :  { %3349 = vpow2.f32 %v2529_v7  ;;  %2571 = vadd.xlane.f32.xlu0 %v2570_v0 }
 0x9f6   :  { %v2482_v17 = vpop.xlane.xlu1 %2481 }
 0x9f7   :  { %v5050_v9 = vsub.f32 %v4972_v15, %v2482_v17 }
 0x9f9   :  { %v3350_v18 = vpop.eup %3349  ;;  %v2531_v46 = vmul.f32 1.442695, %v5050_v9 }
 0x9fa   :  { %v2573_v49 = vsel %vm420_vm0, %v3350_v18, 0.0 }
 0x9fb   :  { %3351 = vpow2.f32 %v2531_v46  ;;  %2574 = vadd.xlane.f32.xlu1 %v2573_v49 }
 0x9fe   :  { %v2485_v43 = vpop.xlane.xlu2 %2484 }
 0x9ff   :  { %v5055_v30 = vsub.f32 %v4977_v20, %v2485_v43 }
 0xa01   :  { %v3352_v2 = vpop.eup %3351  ;;  %v2533_v34 = vmul.f32 1.442695, %v5055_v30 }
 0xa02   :  { %v2576_v19 = vsel %vm420_vm0, %v3352_v2, 0.0 }
 0xa03   :  { %3353 = vpow2.f32 %v2533_v34  ;;  %2577 = vadd.xlane.f32.xlu2 %v2576_v19 }
 0xa06   :  { %v2488_v15 = vpop.xlane.xlu0 %2487 }
 0xa07   :  { %v5060_v23 = vsub.f32 %v4984_v3, %v2488_v15 }
 0xa09   :  { %v3354_v37 = vpop.eup %3353  ;;  %v2535_v33 = vmul.f32 1.442695, %v5060_v23 }
 0xa0a   :  { %v2579_v8 = vsel %vm420_vm0, %v3354_v37, 0.0 }
 0xa0b   :  { %3355 = vpow2.f32 %v2535_v33  ;;  %2580 = vadd.xlane.f32.xlu0 %v2579_v8 }
 0xa0e   :  { %v2539_v20 = vpop.xlane.xlu1 %2538 }
 0xa0f   :  { %3357 = vlog2.f32 %v2539_v20 }
 0xa11   :  { %v3356_v16 = vpop.eup %3355 }
 0xa12   :  { %v2582_v24 = vsel %vm420_vm0, %v3356_v16, 0.0 }
 0xa13   :  { %2583 = vadd.xlane.f32.xlu1 %v2582_v24 }
 0xa15   :  { %v3358_v11 = vpop.eup %3357 }
 0xa16   :  { %v2586_v60 = vmul.f32 0.6931472, %v3358_v11  ;;  %v2542_v5 = vpop.xlane.xlu2 %2541 }
 0xa17   :  { %3359 = vlog2.f32 %v2542_v5 }
 0xa18   :  { %v2617_v3 = vsub.f32 %v4981_v47, %v2586_v60 }
 0xa1a   :  { %2633 = vst.msk [vmem:[%s5157_s12] sm:$0xff] %vm420_vm0, %v2617_v3 }
 0xa1d   :  { %v3360_v50 = vpop.eup %3359 }
 0xa1e   :  { %v2588_v36 = vmul.f32 0.6931472, %v3360_v50  ;;  %v2545_v57 = vpop.xlane.xlu0 %2544 }
 0xa1f   :  { %3361 = vlog2.f32 %v2545_v57 }
 0xa20   :  { %v2618_v39 = vsub.f32 %v4990_v48, %v2588_v36 }
 0xa22   :  { %2634 = vst.msk [vmem:[%s5157_s12 + $0x8] sm:$0xff] %vm420_vm0, %v2618_v39 }
 0xa25   :  { %v3362_v56 = vpop.eup %3361 }
 0xa26   :  { %v2590_v6 = vmul.f32 0.6931472, %v3362_v56  ;;  %v2548_v10 = vpop.xlane.xlu1 %2547 }
 0xa27   :  { %3363 = vlog2.f32 %v2548_v10 }
 0xa28   :  { %v2619_v47 = vsub.f32 %v4995_v14, %v2590_v6 }
 0xa2a   :  { %2635 = vst.msk [vmem:[%s5157_s12 + $0x10] sm:$0xff] %vm420_vm0, %v2619_v47 }
 0xa2d   :  { %v3364_v52 = vpop.eup %3363 }
 0xa2e   :  { %v2592_v62 = vmul.f32 0.6931472, %v3364_v52  ;;  %v2551_v26 = vpop.xlane.xlu2 %2550 }
 0xa2f   :  { %3365 = vlog2.f32 %v2551_v26 }
 0xa30   :  { %v2620_v48 = vsub.f32 %v5000_v61, %v2592_v62 }
 0xa32   :  { %2636 = vst.msk [vmem:[%s5157_s12 + $0x18] sm:$0xff] %vm420_vm0, %v2620_v48 }
 0xa35   :  { %v3366_v53 = vpop.eup %3365 }
 0xa36   :  { %v2594_v59 = vmul.f32 0.6931472, %v3366_v53  ;;  %v2554_v54 = vpop.xlane.xlu0 %2553 }
 0xa37   :  { %3367 = vlog2.f32 %v2554_v54 }
 0xa38   :  { %v2621_v14 = vsub.f32 %v5005_v31, %v2594_v59 }
 0xa3a   :  { %2637 = vst.msk [vmem:[%s5157_s12 + $0x20] sm:$0xff] %vm420_vm0, %v2621_v14 }
 0xa3d   :  { %v3368_v27 = vpop.eup %3367 }
 0xa3e   :  { %v2596_v63 = vmul.f32 0.6931472, %v3368_v27  ;;  %v2557_v55 = vpop.xlane.xlu1 %2556 }
 0xa3f   :  { %3369 = vlog2.f32 %v2557_v55 }
 0xa40   :  { %v2622_v61 = vsub.f32 %v5010_v13, %v2596_v63 }
 0xa42   :  { %2638 = vst.msk [vmem:[%s5157_s12 + $0x28] sm:$0xff] %vm420_vm0, %v2622_v61 }
 0xa45   :  { %v3370_v40 = vpop.eup %3369 }
 0xa46   :  { %v2598_v51 = vmul.f32 0.6931472, %v3370_v40  ;;  %v2560_v38 = vpop.xlane.xlu2 %2559 }
 0xa47   :  { %3371 = vlog2.f32 %v2560_v38 }
 0xa48   :  { %v2623_v31 = vsub.f32 %v5015_v41, %v2598_v51 }
 0xa4a   :  { %2639 = vst.msk [vmem:[%s5157_s12 + $0x30] sm:$0xff] %vm420_vm0, %v2623_v31 }
 0xa4d   :  { %v3372_v1 = vpop.eup %3371 }
 0xa4e   :  { %v2600_v4 = vmul.f32 0.6931472, %v3372_v1  ;;  %v2563_v28 = vpop.xlane.xlu0 %2562 }
 0xa4f   :  { %3373 = vlog2.f32 %v2563_v28 }
 0xa50   :  { %v2624_v13 = vsub.f32 %v5020_v12, %v2600_v4 }
 0xa52   :  { %2640 = vst.msk [vmem:[%s5157_s12 + $0x38] sm:$0xff] %vm420_vm0, %v2624_v13 }
 0xa55   :  { %v3374_v21 = vpop.eup %3373 }
 0xa56   :  { %v2602_v58 = vmul.f32 0.6931472, %v3374_v21  ;;  %v2566_v35 = vpop.xlane.xlu1 %2565 }
 0xa57   :  { %3375 = vlog2.f32 %v2566_v35 }
 0xa58   :  { %v2625_v41 = vsub.f32 %v5025_v32, %v2602_v58 }
 0xa5a   :  { %2641 = vst.msk [vmem:[%s5157_s12 + $0x40] sm:$0xff] %vm420_vm0, %v2625_v41 }
 0xa5d   :  { %v3376_v25 = vpop.eup %3375 }
 0xa5e   :  { %v2604_v22 = vmul.f32 0.6931472, %v3376_v25  ;;  %v2569_v7 = vpop.xlane.xlu2 %2568 }
 0xa5f   :  { %3377 = vlog2.f32 %v2569_v7 }
 0xa60   :  { %v2626_v12 = vsub.f32 %v5030_v42, %v2604_v22 }
 0xa62   :  { %2642 = vst.msk [vmem:[%s5157_s12 + $0x48] sm:$0xff] %vm420_vm0, %v2626_v12 }
 0xa65   :  { %v3378_v0 = vpop.eup %3377 }
 0xa66   :  { %v2606_v17 = vmul.f32 0.6931472, %v3378_v0  ;;  %v2572_v18 = vpop.xlane.xlu0 %2571 }
 0xa67   :  { %3379 = vlog2.f32 %v2572_v18 }
 0xa68   :  { %v2627_v32 = vsub.f32 %v5035_v45, %v2606_v17 }
 0xa6a   :  { %2643 = vst.msk [vmem:[%s5157_s12 + $0x50] sm:$0xff] %vm420_vm0, %v2627_v32 }
 0xa6d   :  { %v3380_v46 = vpop.eup %3379 }
 0xa6e   :  { %v2608_v49 = vmul.f32 0.6931472, %v3380_v46  ;;  %v2575_v43 = vpop.xlane.xlu1 %2574 }
 0xa6f   :  { %3381 = vlog2.f32 %v2575_v43 }
 0xa70   :  { %v2628_v42 = vsub.f32 %v5040_v29, %v2608_v49 }
 0xa72   :  { %2644 = vst.msk [vmem:[%s5157_s12 + $0x58] sm:$0xff] %vm420_vm0, %v2628_v42 }
 0xa75   :  { %v3382_v2 = vpop.eup %3381 }
 0xa76   :  { %v2610_v34 = vmul.f32 0.6931472, %v3382_v2  ;;  %v2578_v19 = vpop.xlane.xlu2 %2577 }
 0xa77   :  { %3383 = vlog2.f32 %v2578_v19 }
 0xa78   :  { %v2629_v45 = vsub.f32 %v5045_v44, %v2610_v34 }
 0xa7a   :  { %2645 = vst.msk [vmem:[%s5157_s12 + $0x60] sm:$0xff] %vm420_vm0, %v2629_v45 }
 0xa7d   :  { %v3384_v15 = vpop.eup %3383 }
 0xa7e   :  { %v2612_v37 = vmul.f32 0.6931472, %v3384_v15  ;;  %v2581_v33 = vpop.xlane.xlu0 %2580 }
 0xa7f   :  { %3385 = vlog2.f32 %v2581_v33 }
 0xa80   :  { %v2630_v29 = vsub.f32 %v5050_v9, %v2612_v37 }
 0xa82   :  { %2646 = vst.msk [vmem:[%s5157_s12 + $0x68] sm:$0xff] %vm420_vm0, %v2630_v29 }
 0xa85   :  { %v3386_v8 = vpop.eup %3385 }
 0xa86   :  { %v2614_v20 = vmul.f32 0.6931472, %v3386_v8  ;;  %v2584_v16 = vpop.xlane.xlu1 %2583 }
 0xa87   :  { %3387 = vlog2.f32 %v2584_v16 }
 0xa88   :  { %v2631_v44 = vsub.f32 %v5055_v30, %v2614_v20 }
 0xa8a   :  { %2647 = vst.msk [vmem:[%s5157_s12 + $0x70] sm:$0xff] %vm420_vm0, %v2631_v44 }
 0xa8d   :  { %v3388_v24 = vpop.eup %3387 }
 0xa8e   :  { %v2616_v11 = vmul.f32 0.6931472, %v3388_v24 }
 0xa90   :  { %v2632_v9 = vsub.f32 %v5060_v23, %v2616_v11 }
 0xa92   :  { %2648 = vst.msk [vmem:[%s5157_s12 + $0x78] sm:$0xff] %vm420_vm0, %v2632_v9 }
 0xa93   :  { %2653 = vsyncpa [#allocation3], 1 }

</bundles_post_ra>
